<compile_context>
chip_gen: v6e
topology: v6e:2x2x1
jax: 0.10.0
libtpu: 0.0.40
codegen_flags: <defaults>
</compile_context>

<pallas_src>
import functools
import math

import jax
import jax.numpy as jnp
from jax.experimental import pallas as pl
from jax.experimental.pallas import tpu as pltpu


def _round_up(x, m):
    return -(-x // m) * m


def _super_row_factor(widths, M):
    """Minimal r (power of two <= 128) s.t. r*M*d % 128 == 0 for every d."""
    r = 1
    for d in widths:
        rd = 128 // math.gcd(M * d, 128)
        r = r * rd // math.gcd(r, rd)
    return r


def _chunk_rows(tn):
    """Largest multiple of 8 <= 64 dividing tn (bounds live vregs per chunk)."""
    if tn <= 64:
        return tn
    for c in range(64, 7, -8):
        if tn % c == 0:
            return c
    return 8


def _wavelength_kernel(cn, g_pv_ref, g_b_ref, g_o_ref,
                       p_ref, v_ref, rb_ref, ro_ref,
                       op_ref, ov_ref, orb_ref, oro_ref):
    """One grid step replicates `tn` super-rows (tn*r rays) M times along lanes.

    g_*_ref : (r*d, r*M*d)  constant block-diagonal 0/1 replication matrices
    ray refs: (tn, r*d)     input super-row tiles
    out refs: (tn, r*M*d)   lane-dense replicated tiles (widths % 128 == 0)
    """
    tn = p_ref.shape[0]
    n_chunks = tn // cn            # wrapper guarantees cn | tn

    g_pv = g_pv_ref[...]
    g_b = g_b_ref[...]
    g_o = g_o_ref[...]

    def rep(x_ref, g, o_ref, r0):
        x = x_ref[pl.ds(r0, cn), :]
        # (cn, r*d) @ (r*d, r*M*d): each output column has exactly one 1.0 in
        # the contraction, so this is an exact copy for finite inputs.
        y = jnp.dot(x, g, preferred_element_type=jnp.float32,
                    precision=jax.lax.Precision.HIGHEST)
        o_ref[pl.ds(r0, cn), :] = y.astype(o_ref.dtype)

    def step(c):
        r0 = pl.multiple_of(c * cn, cn)
        rep(p_ref, g_pv, op_ref, r0)
        rep(v_ref, g_pv, ov_ref, r0)
        rep(rb_ref, g_b, orb_ref, r0)
        rep(ro_ref, g_o, oro_ref, r0)

    if n_chunks == 1:
        step(0)
    else:
        def body(c, carry):
            step(c)
            return carry
        jax.lax.fori_loop(0, n_chunks, body, 0, unroll=True)


def wavelength_forward(P, V, rays_base, rays_object, lower, upper,
                       num_samples, *, max_super_rows_per_step=512,
                       tile_vmem_budget=20 << 20):
    """Pallas-backed equivalent of Wavelength(lower, upper).forward(inputs)."""
    N, D = P.shape
    Db = rays_base.shape[1]
    Do = rays_object.shape[1]
    M = int(num_samples)
    dtype = P.dtype
    item = jnp.dtype(dtype).itemsize
    dims = (D, D, Db, Do)

    if not jnp.issubdtype(dtype, jnp.floating):
        # TODO(synk): non-float ray data would need a VPU copy path.
        raise NotImplementedError("MXU replication path requires float rays")

    # sample1d(lower, upper): deterministic linear sampling (wrapper glue).
    chromatic_space = jnp.linspace(jnp.asarray(lower, dtype),
                                   jnp.asarray(upper, dtype), M, dtype=dtype)
    # Tiny (N*M,) wavelength vector: plain XLA broadcast, kept out of the
    # kernel so the pipeline only carries the wide ray streams.
    rays_wavelength = jnp.tile(chromatic_space, (N,))

    # ---- super-rows: r rays per kernel row so every output slab width is a
    # multiple of 128 lanes (unmasked stores, no output VMEM lane padding). ---
    r = _super_row_factor((D, Db, Do), M)

    rem = N % r
    N_pad = N + (r - rem) if rem else N
    if rem:
        # Input-side padding is cheap (inputs are 1/M of total traffic); the
        # output [:N*M] slice below is the only extra HBM pass and only
        # triggers when N is not a multiple of r.
        pad = ((0, N_pad - N), (0, 0))
        P_in, V_in = jnp.pad(P, pad), jnp.pad(V, pad)
        rb_in, ro_in = jnp.pad(rays_base, pad), jnp.pad(rays_object, pad)
    else:
        P_in, V_in, rb_in, ro_in = P, V, rays_base, rays_object

    N_super = N_pad // r
    # Free row-major views: (N_pad, d) -> (N_super, r*d).
    P2 = P_in.reshape(N_super, r * D)
    V2 = V_in.reshape(N_super, r * D)
    rb2 = rb_in.reshape(N_super, r * Db)
    ro2 = ro_in.reshape(N_super, r * Do)

    # ---- tiling: biggest step under the VMEM budget, but >= 4 roughly even
    # steps when there is enough work (2 balanced steps per TensorCore on
    # dual-TC chips; extra per-step overhead is noise on single-TC chips). ----
    def lanes(c):
        return _round_up(max(int(c), 1), 128)

    bytes_per_srow = (sum(lanes(r * d) for d in dims) +          # inputs (padded)
                      sum(lanes(r * M * d) for d in dims)) * item  # outputs (dense)
    tn_cap = max(8, (tile_vmem_budget // (2 * bytes_per_srow)) // 8 * 8)
    tn_cap = min(tn_cap, max_super_rows_per_step)

    if N_super < 64 and N_super <= tn_cap:
        tn = N_super                     # single step; block == full array dim
    else:
        g = max(4, pl.cdiv(N_super, tn_cap))
        if g % 2:
            g += 1                       # even step count -> balanced 2-TC split
        tn = min(tn_cap, _round_up(pl.cdiv(N_super, g), 8))
    cn = _chunk_rows(tn)
    grid = (pl.cdiv(N_super, tn),)       # ragged final block clipped by Pallas

    # Block-diagonal replication matrices: one super-row (r rays) in, the
    # M-fold interleaved super-row out, via a single exact 0/1 matmul.
    def make_g(d):
        return jnp.kron(jnp.eye(r, dtype=dtype),
                        jnp.tile(jnp.eye(d, dtype=dtype), (1, M)))

    g_pv, g_b, g_o = make_g(D), make_g(Db), make_g(Do)

    # Explicit scoped-VMEM limit (v5e default is only 16 MiB); 48 MiB is safe
    # on every generation (v7x has 64 MiB physical per TensorCore).
    g_bytes = sum(_round_up(r * d, 8) * lanes(r * M * d) * item
                  for d in (D, Db, Do))
    vmem_est = 2 * tn * bytes_per_srow + 2 * g_bytes
    vmem_limit = int(min(max(2 * vmem_est, 32 << 20), 48 << 20))

    kernel = functools.partial(_wavelength_kernel, cn)

    out_shapes = (
        jax.ShapeDtypeStruct((N_super, r * M * D), dtype),    # new_P
        jax.ShapeDtypeStruct((N_super, r * M * D), dtype),    # new_V
        jax.ShapeDtypeStruct((N_super, r * M * Db), dtype),   # new_rays_base
        jax.ShapeDtypeStruct((N_super, r * M * Do), dtype),   # new_rays_object
    )

    outs = pl.pallas_call(
        kernel,
        out_shape=out_shapes,
        grid_spec=pltpu.PrefetchScalarGridSpec(
            num_scalar_prefetch=0,
            grid=grid,
            in_specs=[
                pl.BlockSpec((r * D, r * M * D), lambda i: (0, 0)),    # G for P/V
                pl.BlockSpec((r * Db, r * M * Db), lambda i: (0, 0)),  # G for base
                pl.BlockSpec((r * Do, r * M * Do), lambda i: (0, 0)),  # G for object
                pl.BlockSpec((tn, r * D), lambda i: (i, 0)),           # P tile
                pl.BlockSpec((tn, r * D), lambda i: (i, 0)),           # V tile
                pl.BlockSpec((tn, r * Db), lambda i: (i, 0)),          # base tile
                pl.BlockSpec((tn, r * Do), lambda i: (i, 0)),          # object tile
            ],
            out_specs=[
                pl.BlockSpec((tn, r * M * D), lambda i: (i, 0)),
                pl.BlockSpec((tn, r * M * D), lambda i: (i, 0)),
                pl.BlockSpec((tn, r * M * Db), lambda i: (i, 0)),
                pl.BlockSpec((tn, r * M * Do), lambda i: (i, 0)),
            ],
        ),
        compiler_params=pltpu.CompilerParams(
            dimension_semantics=("parallel",),
            vmem_limit_bytes=vmem_limit),
    )(g_pv, g_b, g_o, P2, V2, rb2, ro2)

    op2, ov2, orb2, oro2 = outs

    # (N_super, r*M*d) -> (N_pad*M, d) is a free row-major view.
    new_P = op2.reshape(N_pad * M, D)
    new_V = ov2.reshape(N_pad * M, D)
    new_rays_base = orb2.reshape(N_pad * M, Db)
    new_rays_object = oro2.reshape(N_pad * M, Do)
    if N_pad != N:
        # TODO(synk): one remaining extra HBM pass for non-r-aligned N; could
        # be removed with a tiny tail kernel + input_output_aliases if needed.
        new_P, new_V = new_P[:N * M], new_V[:N * M]
        new_rays_base = new_rays_base[:N * M]
        new_rays_object = new_rays_object[:N * M]

    return {
        "P": new_P,
        "V": new_V,
        "rays_base": new_rays_base,
        "rays_object": new_rays_object,
        "rays_wavelength": rays_wavelength,
        "var_wavelength": chromatic_space,
    }


if __name__ == "__main__":
    key = jax.random.PRNGKey(0)

    D, Db, Do, M = 3, 2, 2, 8
    lower, upper = 400.0, 700.0  # nm
    chrom_ref = jnp.linspace(lower, upper, M, dtype=jnp.float32)

    # Cases exercise: r-aligned single step (no pad, no trailing copy),
    # ragged N (padded-tail path), multi-step grid with a ragged final block,
    # and a multi-chunk in-kernel loop with an even 4-step grid.
    for N in (64, 20, 1088, 8192):
        k1, k2, k3, k4 = jax.random.split(jax.random.fold_in(key, N), 4)
        P = jax.random.normal(k1, (N, D), dtype=jnp.float32)
        V = jax.random.normal(k2, (N, D), dtype=jnp.float32)
        rays_base = jax.random.normal(k3, (N, Db), dtype=jnp.float32)
        rays_object = jax.random.normal(k4, (N, Do), dtype=jnp.float32)

        out = wavelength_forward(P, V, rays_base, rays_object, lower, upper, M)
        out = jax.tree_util.tree_map(jax.block_until_ready, out)

        assert out["P"].shape == (N * M, D)
        assert out["V"].shape == (N * M, D)
        assert out["rays_base"].shape == (N * M, Db)
        assert out["rays_object"].shape == (N * M, Do)
        assert out["rays_wavelength"].shape == (N * M,)
        assert jnp.allclose(out["P"], jnp.repeat(P, M, axis=0))
        assert jnp.allclose(out["V"], jnp.repeat(V, M, axis=0))
        assert jnp.allclose(out["rays_base"], jnp.repeat(rays_base, M, axis=0))
        assert jnp.allclose(out["rays_object"], jnp.repeat(rays_object, M, axis=0))
        assert jnp.allclose(out["rays_wavelength"], jnp.tile(chrom_ref, (N,)))
        assert jnp.allclose(out["var_wavelength"], chrom_ref)

    print("KERNEL_OK")
</pallas_src>

<mosaic_0001>
module attributes {stable_mosaic.version = 11 : i64} {
  func.func @_wavelength_kernel(%arg0: i32, %arg1: memref<48x384xf32, #tpu.memory_space<vmem>>, %arg2: memref<32x256xf32, #tpu.memory_space<vmem>>, %arg3: memref<32x256xf32, #tpu.memory_space<vmem>>, %arg4: memref<4x48xf32, #tpu.memory_space<vmem>>, %arg5: memref<4x48xf32, #tpu.memory_space<vmem>>, %arg6: memref<4x32xf32, #tpu.memory_space<vmem>>, %arg7: memref<4x32xf32, #tpu.memory_space<vmem>>, %arg8: memref<4x384xf32, #tpu.memory_space<vmem>>, %arg9: memref<4x384xf32, #tpu.memory_space<vmem>>, %arg10: memref<4x256xf32, #tpu.memory_space<vmem>>, %arg11: memref<4x256xf32, #tpu.memory_space<vmem>>) attributes {dimension_semantics = [#tpu.dimension_semantics<parallel>], iteration_bounds = array<i64: 1>, scalar_prefetch = 0 : i64, scratch_operands = 0 : i64, tpu.core_type = #tpu.core_type<tc>, window_params = [{pipeline_mode = #tpu.pipeline_mode<synchronous>, transform_indices = @transform_0, window_bounds = array<i64: 48, 384>}, {pipeline_mode = #tpu.pipeline_mode<synchronous>, transform_indices = @transform_1, window_bounds = array<i64: 32, 256>}, {pipeline_mode = #tpu.pipeline_mode<synchronous>, transform_indices = @transform_2, window_bounds = array<i64: 32, 256>}, {transform_indices = @transform_3, window_bounds = array<i64: 4, 48>}, {transform_indices = @transform_4, window_bounds = array<i64: 4, 48>}, {transform_indices = @transform_5, window_bounds = array<i64: 4, 32>}, {transform_indices = @transform_6, window_bounds = array<i64: 4, 32>}, {transform_indices = @transform_7, window_bounds = array<i64: 4, 384>}, {transform_indices = @transform_8, window_bounds = array<i64: 4, 384>}, {transform_indices = @transform_9, window_bounds = array<i64: 4, 256>}, {transform_indices = @transform_10, window_bounds = array<i64: 4, 256>}]} {
    %c0 = arith.constant 0 : index
    %c0_0 = arith.constant 0 : index
    %0 = vector.load %arg1[%c0, %c0_0] : memref<48x384xf32, #tpu.memory_space<vmem>>, vector<48x384xf32>
    %c0_1 = arith.constant 0 : index
    %c0_2 = arith.constant 0 : index
    %1 = vector.load %arg2[%c0_1, %c0_2] : memref<32x256xf32, #tpu.memory_space<vmem>>, vector<32x256xf32>
    %c0_3 = arith.constant 0 : index
    %c0_4 = arith.constant 0 : index
    %2 = vector.load %arg3[%c0_3, %c0_4] : memref<32x256xf32, #tpu.memory_space<vmem>>, vector<32x256xf32>
    %c0_i32 = arith.constant 0 : i32
    %3 = tpu.assume_multiple %c0_i32, 4 : i32
    %4 = arith.index_cast %3 : i32 to index
    %c0_5 = arith.constant 0 : index
    %5 = vector.load %arg4[%4, %c0_5] : memref<4x48xf32, #tpu.memory_space<vmem>>, vector<4x48xf32>
    %cst = arith.constant dense<0.000000e+00> : vector<4x384xf32>
    %6 = tpu.matmul %5, %0, %cst {dimension_numbers = #tpu.dot_dimension_numbers<[1], [0], [0], [1], [0, 0, 1, 1], [], []>, precision = #tpu.contract_precision<fp32>} : vector<4x48xf32>, vector<48x384xf32>, vector<4x384xf32> -> vector<4x384xf32>
    %7 = arith.index_cast %3 : i32 to index
    %c0_6 = arith.constant 0 : index
    %8 = vector.load %arg8[%7, %c0_6] : memref<4x384xf32, #tpu.memory_space<vmem>>, vector<4x384xf32>
    tpu.vector_store %arg8[%7, %c0_6], %6 {strides = array<i32>} : memref<4x384xf32, #tpu.memory_space<vmem>>, vector<4x384xf32>,
    %9 = arith.index_cast %3 : i32 to index
    %c0_7 = arith.constant 0 : index
    %10 = vector.load %arg5[%9, %c0_7] : memref<4x48xf32, #tpu.memory_space<vmem>>, vector<4x48xf32>
    %cst_8 = arith.constant dense<0.000000e+00> : vector<4x384xf32>
    %11 = tpu.matmul %10, %0, %cst_8 {dimension_numbers = #tpu.dot_dimension_numbers<[1], [0], [0], [1], [0, 0, 1, 1], [], []>, precision = #tpu.contract_precision<fp32>} : vector<4x48xf32>, vector<48x384xf32>, vector<4x384xf32> -> vector<4x384xf32>
    %12 = arith.index_cast %3 : i32 to index
    %c0_9 = arith.constant 0 : index
    %13 = vector.load %arg9[%12, %c0_9] : memref<4x384xf32, #tpu.memory_space<vmem>>, vector<4x384xf32>
    tpu.vector_store %arg9[%12, %c0_9], %11 {strides = array<i32>} : memref<4x384xf32, #tpu.memory_space<vmem>>, vector<4x384xf32>,
    %14 = arith.index_cast %3 : i32 to index
    %c0_10 = arith.constant 0 : index
    %15 = vector.load %arg6[%14, %c0_10] : memref<4x32xf32, #tpu.memory_space<vmem>>, vector<4x32xf32>
    %cst_11 = arith.constant dense<0.000000e+00> : vector<4x256xf32>
    %16 = tpu.matmul %15, %1, %cst_11 {dimension_numbers = #tpu.dot_dimension_numbers<[1], [0], [0], [1], [0, 0, 1, 1], [], []>, precision = #tpu.contract_precision<fp32>} : vector<4x32xf32>, vector<32x256xf32>, vector<4x256xf32> -> vector<4x256xf32>
    %17 = arith.index_cast %3 : i32 to index
    %c0_12 = arith.constant 0 : index
    %18 = vector.load %arg10[%17, %c0_12] : memref<4x256xf32, #tpu.memory_space<vmem>>, vector<4x256xf32>
    tpu.vector_store %arg10[%17, %c0_12], %16 {strides = array<i32>} : memref<4x256xf32, #tpu.memory_space<vmem>>, vector<4x256xf32>,
    %19 = arith.index_cast %3 : i32 to index
    %c0_13 = arith.constant 0 : index
    %20 = vector.load %arg7[%19, %c0_13] : memref<4x32xf32, #tpu.memory_space<vmem>>, vector<4x32xf32>
    %cst_14 = arith.constant dense<0.000000e+00> : vector<4x256xf32>
    %21 = tpu.matmul %20, %2, %cst_14 {dimension_numbers = #tpu.dot_dimension_numbers<[1], [0], [0], [1], [0, 0, 1, 1], [], []>, precision = #tpu.contract_precision<fp32>} : vector<4x32xf32>, vector<32x256xf32>, vector<4x256xf32> -> vector<4x256xf32>
    %22 = arith.index_cast %3 : i32 to index
    %c0_15 = arith.constant 0 : index
    %23 = vector.load %arg11[%22, %c0_15] : memref<4x256xf32, #tpu.memory_space<vmem>>, vector<4x256xf32>
    tpu.vector_store %arg11[%22, %c0_15], %21 {strides = array<i32>} : memref<4x256xf32, #tpu.memory_space<vmem>>, vector<4x256xf32>,
    return
  }
  func.func @transform_0(%arg0: i32) -> (i32, i32) {
    %c0_i32 = arith.constant 0 : i32
    %c0_i32_0 = arith.constant 0 : i32
    %c0_i32_1 = arith.constant 0 : i32
    return %c0_i32, %c0_i32_0 : i32, i32
  }
  func.func @transform_1(%arg0: i32) -> (i32, i32) {
    %c0_i32 = arith.constant 0 : i32
    %c0_i32_0 = arith.constant 0 : i32
    %c0_i32_1 = arith.constant 0 : i32
    return %c0_i32, %c0_i32_0 : i32, i32
  }
  func.func @transform_2(%arg0: i32) -> (i32, i32) {
    %c0_i32 = arith.constant 0 : i32
    %c0_i32_0 = arith.constant 0 : i32
    %c0_i32_1 = arith.constant 0 : i32
    return %c0_i32, %c0_i32_0 : i32, i32
  }
  func.func @transform_3(%arg0: i32) -> (i32, i32) {
    %c0_i32 = arith.constant 0 : i32
    %c0_i32_0 = arith.constant 0 : i32
    return %arg0, %c0_i32 : i32, i32
  }
  func.func @transform_4(%arg0: i32) -> (i32, i32) {
    %c0_i32 = arith.constant 0 : i32
    %c0_i32_0 = arith.constant 0 : i32
    return %arg0, %c0_i32 : i32, i32
  }
  func.func @transform_5(%arg0: i32) -> (i32, i32) {
    %c0_i32 = arith.constant 0 : i32
    %c0_i32_0 = arith.constant 0 : i32
    return %arg0, %c0_i32 : i32, i32
  }
  func.func @transform_6(%arg0: i32) -> (i32, i32) {
    %c0_i32 = arith.constant 0 : i32
    %c0_i32_0 = arith.constant 0 : i32
    return %arg0, %c0_i32 : i32, i32
  }
  func.func @transform_7(%arg0: i32) -> (i32, i32) {
    %c0_i32 = arith.constant 0 : i32
    %c0_i32_0 = arith.constant 0 : i32
    return %arg0, %c0_i32 : i32, i32
  }
  func.func @transform_8(%arg0: i32) -> (i32, i32) {
    %c0_i32 = arith.constant 0 : i32
    %c0_i32_0 = arith.constant 0 : i32
    return %arg0, %c0_i32 : i32, i32
  }
  func.func @transform_9(%arg0: i32) -> (i32, i32) {
    %c0_i32 = arith.constant 0 : i32
    %c0_i32_0 = arith.constant 0 : i32
    return %arg0, %c0_i32 : i32, i32
  }
  func.func @transform_10(%arg0: i32) -> (i32, i32) {
    %c0_i32 = arith.constant 0 : i32
    %c0_i32_0 = arith.constant 0 : i32
    return %arg0, %c0_i32 : i32, i32
  }
}

</mosaic_0001>

<bundles_post_ra>
// kernel: tpu_custom_call.1
= control target key start
LH: loop header
LB: loop body
LE: loop exit
PB: predicated region body
PF: predicated region fallthrough
CT: control target
= control target key end

     0   :  { %16 = vsyncpa [#allocation3], 0  ;;  %s4987_s0 = inlined_call_operand.hbm [shape: f32[48,384], index: 0, kind: input, shape index: {}]   ;;  %s4988_s1 = inlined_call_operand.hbm [shape: f32[32,256], index: 1, kind: input, shape index: {}]   ;;  %s4989_s2 = inlined_call_operand.hbm [shape: f32[32,256], index: 2, kind: input, shape index: {}]   ;;  %s4990_s3 = inlined_call_operand.vmem [shape: f32[4,48], index: 3, kind: input, shape index: {}]   ;;  %s4991_s4 = inlined_call_operand.hbm [shape: f32[4,48], index: 4, kind: input, shape index: {}]   ;;  %s4992_s5 = inlined_call_operand.vmem [shape: f32[4,32], index: 5, kind: input, shape index: {}]   ;;  %s4993_s6 = inlined_call_operand.hbm [shape: f32[4,32], index: 6, kind: input, shape index: {}]   ;;  %s4994_s7 = inlined_call_operand.hbm [shape: f32[4,384], index: 7, kind: output, shape index: {0}]   ;;  %s4995_s8 = inlined_call_operand.hbm [shape: f32[4,384], index: 8, kind: output, shape index: {1}]   ;;  %s4996_s9 = inlined_call_operand.hbm [shape: f32[4,256], index: 9, kind: output, shape index: {2}]   ;;  %s4997_s10 = inlined_call_operand.hbm [shape: f32[4,256], index: 10, kind: output, shape index: {3}]  }
   0x1   :  { %17 = vsyncpa [#allocation6], 0 }
   0x2   :  { %18 = vsyncpa [#allocation9], 0 }
   0x3   :  { %19 = vsyncpa [#allocation4], 0 }
   0x4   :  { %20 = vsyncpa [#allocation13], 0 }
   0x5   :  { %21 = vsyncpa [#allocation16], 0  ;;  %s4008_s13 = smov [#allocation5]  }
   0x6   :  { %s39_s14 = sshll.u32 %s4008_s13, 4  ;;  %s40_s14 = int_to_ptr.vmem [resolvable:$true] %s39_s14 }
   0x7   :  { %s3824_s15 = scalar_lea.vmem %s40_s14, 1024  ;;  %p3829_p1 = scmp.lt.s32.totalorder %s40_s14, %s40_s14 }
   0x8   :  { %p3825_p0 = scmp.ne.s32.totalorder %s40_s14, %s3824_s15  ;;  %p3830_p2 = scmp.lt.s32.totalorder %s3824_s15, %s3824_s15 }
   0xa   :  { %p3831_p3 = por %p3830_p2, %p3829_p1 }
   0xc   :  { %p3832_p4 = pnand %p3831_p3, %p3825_p0 }
   0xe   :  { %3835 = shalt.err (!%p3832_p4)
}
   0xf   :  { %s4009_s16 = smov 256   ;;  %s4010_s17 = smov 16  }
  0x10   :  { %45 = dma.hbm_to_vmem [thread:$0]  %s4988_s1, 1024, %s40_s14, [#allocation6], %s4009_s16, %s4009_s16, %s4010_s17  }
  0x11   :  { %s4011_s20 = smov [#allocation8]   ;;  %s4012_s22 = smov [#allocation2]  }
  0x12   :  { %s66_s21 = sshll.u32 %s4011_s20, 4  ;;  %s27_s23 = sshll.u32 %s4012_s22, 4  ;;  %s67_s21 = int_to_ptr.vmem [resolvable:$true] %s66_s21  ;;  %s28_s23 = int_to_ptr.vmem [resolvable:$true] %s27_s23 }
  0x13   :  { %s3844_s24 = scalar_lea.vmem %s67_s21, 64  ;;  %p3849_p6 = scmp.lt.s32.totalorder %s67_s21, %s67_s21 }
  0x14   :  { %p3845_p5 = scmp.ne.s32.totalorder %s67_s21, %s3844_s24  ;;  %p3850_p7 = scmp.lt.s32.totalorder %s3844_s24, %s3844_s24 }
  0x16   :  { %p3851_p8 = por %p3850_p7, %p3849_p6 }
  0x18   :  { %p3852_p9 = pnand %p3851_p8, %p3845_p5 }
  0x1a   :  { %3855 = shalt.err (!%p3852_p9)
}
  0x1b   :  { %69 = dma.hbm_to_vmem [thread:$0]  %s4991_s4, 64, %s67_s21, [#allocation9]  }
  0x1c   :  { %s3864_s27 = scalar_lea.vmem %s28_s23, 2304  ;;  %p3869_p11 = scmp.lt.s32.totalorder %s28_s23, %s28_s23 }
  0x1d   :  { %p3865_p10 = scmp.ne.s32.totalorder %s28_s23, %s3864_s27  ;;  %p3870_p12 = scmp.lt.s32.totalorder %s3864_s27, %s3864_s27 }
  0x1f   :  { %p3871_p13 = por %p3870_p12, %p3869_p11 }
  0x21   :  { %p3872_p0 = pnand %p3871_p13, %p3865_p10 }
  0x23   :  { %3875 = shalt.err (!%p3872_p0)
}
  0x24   :  { %s4013_s1 = smov 384   ;;  %s4014_s28 = smov 24  }
  0x25   :  { %33 = dma.hbm_to_vmem [thread:$0]  %s4987_s0, 2304, %s28_s23, [#allocation3], %s4013_s1, %s4013_s1, %s4014_s28  }
  0x26   :  { %s4015_s11 = smov [#allocation7]   ;;  %s4016_s13 = smov [#allocation10]  }
  0x27   :  { %s51_s12 = sshll.u32 %s4015_s11, 4  ;;  %s78_s14 = sshll.u32 %s4016_s13, 4  ;;  %s52_s12 = int_to_ptr.vmem [resolvable:$true] %s51_s12  ;;  %s79_s14 = int_to_ptr.vmem [resolvable:$true] %s78_s14 }
  0x28   :  { %s3884_s4 = scalar_lea.vmem %s52_s12, 1024  ;;  %p3889_p2 = scmp.lt.s32.totalorder %s52_s12, %s52_s12 }
  0x29   :  { %p3885_p1 = scmp.ne.s32.totalorder %s52_s12, %s3884_s4  ;;  %p3890_p3 = scmp.lt.s32.totalorder %s3884_s4, %s3884_s4 }
  0x2b   :  { %p3891_p4 = por %p3890_p3, %p3889_p2 }
  0x2d   :  { %p3892_p5 = pnand %p3891_p4, %p3885_p1 }
  0x2f   :  { %3895 = shalt.err (!%p3892_p5)
}
  0x30   :  { %57 = dma.hbm_to_vmem [thread:$0]  %s4989_s2, 1024, %s52_s12, [#allocation6], %s4009_s16, %s4009_s16, %s4010_s17  }
  0x31   :  { %s3904_s0 = scalar_lea.vmem %s79_s14, 64  ;;  %p3909_p7 = scmp.lt.s32.totalorder %s79_s14, %s79_s14 }
  0x32   :  { %p3905_p6 = scmp.ne.s32.totalorder %s79_s14, %s3904_s0  ;;  %p3910_p8 = scmp.lt.s32.totalorder %s3904_s0, %s3904_s0 }
  0x34   :  { %p3911_p9 = por %p3910_p8, %p3909_p7 }
  0x36   :  { %p3912_p10 = pnand %p3911_p9, %p3905_p6 }
  0x38   :  { %3915 = shalt.err (!%p3912_p10)
}
  0x39   :  { %81 = dma.hbm_to_vmem [thread:$0]  %s4993_s6, 64, %s79_s14, [#allocation9]  }
  0x3a   :  { %3996 = dma.done.wait [#allocation3], 2304  }
  0x3b   :  { %3997 = vsyncadd [#allocation3], 4294964992 }
  0x3c   :  { %3998 = dma.done.wait [#allocation6], 2048  }
  0x3d   :  { %3999 = vsyncadd [#allocation6], 4294965248 }
  0x3e   :  { %4000 = dma.done.wait [#allocation9], 128  }
  0x3f   :  { %4001 = vsyncadd [#allocation9], 4294967168  ;;  %v4017_v0 = vmov 0.0   ;;  %v113_v1 = vld [vmem:[#allocation2 + $0x80] sm:$0xff]  ;;  %v112_v2 = vld [vmem:[#allocation2 + $0x78] sm:$0xff]  ;;  %vm132_vm0 = vcmask 392192  }
  0x40   :  { %212 = vmatprep.mubr.f32.mxu0 %v4017_v0  ;;  %348 = vmatprep.mubr.f32.mxu1 %v4017_v0  ;;  %v110_v3 = vld [vmem:[#allocation2 + $0x68] sm:$0xff]  ;;  %v4101_v4 = vand.u32 4294901760, %v113_v1  ;;  %v4103_v5 = vand.u32 4294901760, %v112_v2  ;;  %v109_v7 = vld [vmem:[#allocation2 + $0x60] sm:$0xff]  ;;  %v107_v8 = vld [vmem:[#allocation2 + $0x50] sm:$0xff]  ;;  %vm4018_vm1 = vmmov 0  }
  0x41   :  { %v4105_v6 = vand.u32 4294901760, %v110_v3  ;;  %v106_v9 = vld [vmem:[#allocation2 + $0x48] sm:$0xff]  ;;  %v4107_v10 = vand.u32 4294901760, %v109_v7  ;;  %v4109_v11 = vand.u32 4294901760, %v107_v8  ;;  %v104_v12 = vld [vmem:[#allocation2 + $0x38] sm:$0xff]  ;;  %v103_v13 = vld [vmem:[#allocation2 + $0x30] sm:$0xff] }
  0x42   :  { %v101_v14 = vld [vmem:[#allocation2 + $0x20] sm:$0xff]  ;;  %157 = vmatprep.subr.mxu0 %v4101_v4  ;;  %v4112_v15 = vand.u32 4294901760, %v106_v9  ;;  %v4114_v16 = vand.u32 4294901760, %v104_v12  ;;  %v4117_v17 = vsub.f32 %v113_v1, %v4101_v4  ;;  %v100_v18 = vld [vmem:[#allocation2 + $0x18] sm:$0xff]  ;;  %v98_v19 = vld [vmem:[#allocation2 + $0x8] sm:$0xff]  ;;  %v4120_v20 = vand.u32 4294901760, %v103_v13 }
  0x43   :  { %159 = vmatpush1.msra.mxu0 %v4103_v5  ;;  %v4122_v21 = vand.u32 4294901760, %v101_v14  ;;  %v4125_v22 = vsub.f32 %v112_v2, %v4103_v5  ;;  %v4128_v23 = vsub.f32 %v110_v3, %v4105_v6  ;;  %v131_v24 = vld [vmem:[%s4990_s3] sm:$0xf]  ;;  %v4137_v26 = vand.u32 4294901760, %v100_v18 }
  0x44   :  { %161 = vmatprep.subr.mxu0 %v4105_v6  ;;  %v4135_v25 = vand.u32 4294901760, %v4117_v17  ;;  %v97_v27 = vld [vmem:[#allocation2] sm:$0xff]  ;;  %v4140_v28 = vsub.f32 %v109_v7, %v4107_v10  ;;  %v4143_v29 = vsub.f32 %v107_v8, %v4109_v11  ;;  %v4149_v31 = vand.u32 4294901760, %v98_v19 }
  0x45   :  { %163 = vmatpush1.msra.mxu0 %v4107_v10  ;;  %v4147_v30 = vand.u32 4294901760, %v4125_v22  ;;  %v4152_v32 = vand.u32 4294901760, %v4128_v23  ;;  %v134_v33 = vsel %vm132_vm0, %v131_v24, 0  ;;  %v4171_v40 = vand.u32 4294901760, %v97_v27 }
  0x46   :  { %5013 = vst [vmem:[#allocation23_spill] sm:$0xff] %v4135_v25  ;;  %165 = vmatprep.subr.mxu0 %v4109_v11  ;;  %v247_v34 = vsub.f32 %v4117_v17, %v4135_v25  ;;  %v4159_v35 = vand.u32 4294901760, %v4140_v28  ;;  %v4162_v36 = vand.u32 4294901760, %v4143_v29  ;;  %v4164_v37 = vand.u32 4294901760, %v134_v33 }
  0x47   :  { %5014 = vst [vmem:[#allocation24_spill] sm:$0xff] %v4147_v30  ;;  %5015 = vst [vmem:[#allocation25_spill] sm:$0xff] %v4152_v32  ;;  %167 = vmatpush1.msra.mxu0 %v4112_v15  ;;  %v253_v38 = vsub.f32 %v4125_v22, %v4147_v30  ;;  %v259_v39 = vsub.f32 %v4128_v23, %v4152_v32  ;;  %v4174_v41 = vsub.f32 %v106_v9, %v4112_v15  ;;  %vm2370_vm2 = vcmask 261120  }
  0x48   :  { %5016 = vst [vmem:[#allocation26_spill] sm:$0xff] %v4159_v35  ;;  %5017 = vst [vmem:[#allocation27_spill] sm:$0xff] %v4162_v36  ;;  %169 = vmatprep.subr.mxu0 %v4114_v16  ;;  %v4177_v42 = vand.u32 4294901760, %v247_v34  ;;  %v265_v43 = vsub.f32 %v4140_v28, %v4159_v35  ;;  %v271_v44 = vsub.f32 %v4143_v29, %v4162_v36 }
  0x49   :  { %v4184_v45 = vsub.f32 %v134_v33, %v4164_v37  ;;  %171 = vmatpush1.msra.mxu0 %v4120_v20  ;;  %v4187_v46 = vand.u32 4294901760, %v253_v38  ;;  %v4189_v47 = vand.u32 4294901760, %v259_v39  ;;  %v4192_v48 = vand.u32 4294901760, %v4174_v41  ;;  %v114_v39 = vld [vmem:[#allocation2 + $0x88] sm:$0xff] }
  0x4a   :  { %v4195_v49 = vsub.f32 %v104_v12, %v4114_v16  ;;  %173 = vmatprep.subr.mxu0 %v4122_v21  ;;  %249 = vmatprep.subr.mxu1 %v4177_v42  ;;  %v4199_v50 = vand.u32 4294901760, %v265_v43  ;;  %v4201_v51 = vand.u32 4294901760, %v271_v44  ;;  %v4207_v53 = vsub.f32 %v103_v13, %v4120_v20  ;;  %v111_v43 = vld [vmem:[#allocation2 + $0x70] sm:$0xff] }
  0x4b   :  { %5018 = vst [vmem:[#allocation28_spill] sm:$0xff] %v4192_v48  ;;  %v4204_v52 = vand.u32 4294901760, %v4184_v45  ;;  %175 = vmatpush1.msra.mxu0 %v4137_v26  ;;  %255 = vmatpush1.msra.mxu1 %v4187_v46  ;;  %v277_v54 = vsub.f32 %v4174_v41, %v4192_v48  ;;  %v4217_v56 = vsub.f32 %v101_v14, %v4122_v21  ;;  %v4315_v44 = vand.u32 4294901760, %v114_v39 }
  0x4c   :  { %v4214_v55 = vand.u32 4294901760, %v4195_v49  ;;  %v4220_v57 = vsub.f32 %v100_v18, %v4137_v26  ;;  %177 = vmatprep.subr.mxu0 %v4149_v31  ;;  %261 = vmatprep.subr.mxu1 %v4189_v47  ;;  %v4227_v59 = vand.u32 4294901760, %v4207_v53  ;;  %v4230_v60 = vsub.f32 %v98_v19, %v4149_v31 }
  0x4d   :  { %v216_v58 = vsub.f32 %v4184_v45, %v4204_v52  ;;  %v4233_v61 = vsub.f32 %v97_v27, %v4171_v40  ;;  %179 = vmatpush1.msra.mxu0 %v4171_v40  ;;  %267 = vmatpush1.msra.mxu1 %v4199_v50  ;;  %v4237_v62 = vand.u32 4294901760, %v277_v54  ;;  %v4242_v1 = vand.u32 4294901760, %v4217_v56 }
  0x4e   :  { %5019 = vst [vmem:[#allocation29_spill] sm:$0xff] %v4214_v55  ;;  %5020 = vst [vmem:[#allocation30_spill] sm:$0xff] %v4227_v59  ;;  %v283_v63 = vsub.f32 %v4195_v49, %v4214_v55  ;;  %v4245_v2 = vand.u32 4294901760, %v4220_v57  ;;  %273 = vmatprep.subr.mxu1 %v4201_v51  ;;  %378 = vmatprep.subr.mxu0 %v4117_v17  ;;  %v289_v7 = vsub.f32 %v4207_v53, %v4227_v59 }
  0x4f   :  { %5021 = vst [vmem:[#allocation31_spill] sm:$0xff] %v4230_v60  ;;  %5022 = vst [vmem:[#allocation32_spill] sm:$0xff] %v4233_v61  ;;  %v4249_v3 = vand.u32 4294901760, %v216_v58  ;;  %v4254_v8 = vand.u32 4294901760, %v4230_v60  ;;  %v4257_v9 = vand.u32 4294901760, %v4233_v61  ;;  %279 = vmatpush1.msra.mxu1 %v4237_v62  ;;  %v295_v13 = vsub.f32 %v4217_v56, %v4242_v1  ;;  %v108_v58 = vld [vmem:[#allocation2 + $0x58] sm:$0xff] }
  0x50   :  { %5023 = vst [vmem:[#allocation33_spill] sm:$0xff] %v4242_v1  ;;  %5024 = vst [vmem:[#allocation34_spill] sm:$0xff] %v4245_v2  ;;  %v4260_v12 = vand.u32 4294901760, %v283_v63  ;;  %v301_v14 = vsub.f32 %v4220_v57, %v4245_v2  ;;  %v4267_v18 = vand.u32 4294901760, %v289_v7  ;;  %v4321_v54 = vand.u32 4294901760, %v111_v43  ;;  %v105_v63 = vld [vmem:[#allocation2 + $0x40] sm:$0xff] }
  0x51   :  { %5025 = vst [vmem:[#allocation35_spill] sm:$0xff] %v4254_v8  ;;  %5026 = vst [vmem:[#allocation36_spill] sm:$0xff] %v4257_v9  ;;  %218 = vmatmul.mubr.f32.vlgmr.msra.gmra.mxu0 %v4249_v3  ;;  %v307_v19 = vsub.f32 %v4230_v60, %v4254_v8  ;;  %v313_v24 = vsub.f32 %v4233_v61, %v4257_v9  ;;  %v4275_v27 = vand.u32 4294901760, %v295_v13  ;;  %v4332_v13 = vand.u32 4294901760, %v108_v58 }
  0x52   :  { %381 = vmatpush1.msra.mxu0 %v4125_v22  ;;  %285 = vmatprep.subr.mxu1 %v4260_v12  ;;  %v4277_v33 = vand.u32 4294901760, %v301_v14  ;;  %v4328_v7 = vsub.f32 %v114_v39, %v4315_v44  ;;  %v102_v14 = vld [vmem:[#allocation2 + $0x28] sm:$0xff] }
  0x53   :  { %384 = vmatprep.subr.mxu0 %v4128_v23  ;;  %291 = vmatpush1.msra.mxu1 %v4267_v18  ;;  %v4281_v34 = vand.u32 4294901760, %v307_v19  ;;  %v4283_v38 = vand.u32 4294901760, %v313_v24  ;;  %v4337_v19 = vsub.f32 %v111_v43, %v4321_v54  ;;  %v4341_v24 = vand.u32 4294901760, %v105_v63 }
  0x54   :  { %387 = vmatpush1.msra.mxu0 %v4140_v28  ;;  %297 = vmatprep.subr.mxu1 %v4275_v27  ;;  %v4346_v39 = vand.u32 4294901760, %v4328_v7  ;;  %v4350_v43 = vand.u32 4294901760, %v102_v14 }
  0x55   :  { %390 = vmatprep.subr.mxu0 %v4143_v29  ;;  %303 = vmatpush1.msra.mxu1 %v4277_v33 }
  0x56   :  { %393 = vmatpush1.msra.mxu0 %v4174_v41  ;;  %309 = vmatprep.subr.mxu1 %v4281_v34 }
  0x57   :  { %396 = vmatprep.subr.mxu0 %v4195_v49  ;;  %315 = vmatpush1.msra.mxu1 %v4283_v38 }
  0x58   :  { %399 = vmatpush1.msra.mxu0 %v4207_v53  ;;  %350 = vmatmul.mubr.f32.vlgmr.msra.gmra.mxu1 %v4164_v37 }
  0x59   :  { %402 = vmatprep.subr.mxu0 %v4217_v56  ;;  %474 = vmatprep.subr.mxu1 %v4101_v4 }
  0x5a   :  { %405 = vmatpush1.msra.mxu0 %v4220_v57  ;;  %476 = vmatpush1.msra.mxu1 %v4103_v5 }
  0x5b   :  { %408 = vmatprep.subr.mxu0 %v4230_v60  ;;  %478 = vmatprep.subr.mxu1 %v4105_v6 }
  0x5c   :  { %411 = vmatpush1.msra.mxu0 %v4233_v61  ;;  %444 = vmatprep.mubr.f32.mxu0 %v4017_v0 }
  0x5d   :  { %480 = vmatpush1.msra.mxu1 %v4107_v10  ;;  %447 = vmatmul.mubr.f32.vlgmr.msra.gmra.mxu0 %v4184_v45 }
  0x5e   :  { %482 = vmatprep.subr.mxu1 %v4109_v11  ;;  %562 = vmatprep.subr.mxu0 %v4135_v25 }
  0x5f   :  { %484 = vmatpush1.msra.mxu1 %v4112_v15  ;;  %566 = vmatpush1.msra.mxu0 %v4147_v30 }
  0x60   :  { %486 = vmatprep.subr.mxu1 %v4114_v16  ;;  %570 = vmatprep.subr.mxu0 %v4152_v32 }
  0x61   :  { %488 = vmatpush1.msra.mxu1 %v4120_v20  ;;  %574 = vmatpush1.msra.mxu0 %v4159_v35 }
  0x62   :  { %490 = vmatprep.subr.mxu1 %v4122_v21  ;;  %578 = vmatprep.subr.mxu0 %v4162_v36 }
  0x63   :  { %492 = vmatpush1.msra.mxu1 %v4137_v26  ;;  %582 = vmatpush1.msra.mxu0 %v4192_v48  ;;  %v4377_v48 = vsub.f32 %v102_v14, %v4350_v43 }
  0x64   :  { %494 = vmatprep.subr.mxu1 %v4149_v31  ;;  %586 = vmatprep.subr.mxu0 %v4214_v55 }
  0x65   :  { %496 = vmatpush1.msra.mxu1 %v4171_v40  ;;  %529 = vmatprep.mubr.f32.mxu1 %v4017_v0  ;;  %v4400_v30 = vand.u32 4294901760, %v4377_v48 }
  0x66   :  { %590 = vmatpush1.msra.mxu0 %v4227_v59  ;;  %533 = vmatmul.mubr.f32.vlgmr.msra.gmra.mxu1 %v4204_v52  ;;  %v4365_v59 = vsub.f32 %v105_v63, %v4341_v24 }
  0x67   :  { %594 = vmatprep.subr.mxu0 %v4242_v1  ;;  %668 = vmatprep.subr.mxu1 %v4101_v4  ;;  %v864_v61 = vsub.f32 %v4377_v48, %v4400_v30 }
  0x68   :  { %598 = vmatpush1.msra.mxu0 %v4245_v2  ;;  %670 = vmatpush1.msra.mxu1 %v4103_v5  ;;  %v99_v2 = vld [vmem:[#allocation2 + $0x10] sm:$0xff]  ;;  %v4386_v36 = vand.u32 4294901760, %v4365_v59 }
  0x69   :  { %602 = vmatprep.subr.mxu0 %v4254_v8  ;;  %672 = vmatprep.subr.mxu1 %v4105_v6  ;;  %v4353_v8 = vsub.f32 %v108_v58, %v4332_v13  ;;  %v4362_v1 = vand.u32 4294901760, %v99_v2  ;;  %v836_v58 = vsub.f32 %v4328_v7, %v4346_v39 }
  0x6a   :  { %606 = vmatpush1.msra.mxu0 %v4257_v9  ;;  %639 = vmatprep.mubr.f32.mxu0 %v4017_v0  ;;  %v4358_v9 = vand.u32 4294901760, %v4337_v19 }
  0x6b   :  { %674 = vmatpush1.msra.mxu1 %v4107_v10  ;;  %641 = vmatmul.mubr.f32.vlgmr.msra.gmra.mxu0 %v4164_v37  ;;  %v4374_v55 = vand.u32 4294901760, %v4353_v8  ;;  %v4389_v35 = vsub.f32 %v99_v2, %v4362_v1  ;;  %v4393_v14 = vand.u32 4294901760, %v836_v58  ;;  %v857_v58 = vsub.f32 %v4365_v59, %v4386_v36 }
  0x6c   :  { %676 = vmatprep.subr.mxu1 %v4109_v11  ;;  %3621 = vmatprep.subr.mxu0 %v4017_v0  ;;  %v843_v63 = vsub.f32 %v4337_v19, %v4358_v9 }
  0x6d   :  { %678 = vmatpush1.msra.mxu1 %v4112_v15  ;;  %3622 = vmatpush3.msra.mxu0 %v4315_v44  ;;  %5027 = vst [vmem:[#allocation37_spill] sm:$0xff] %v4393_v14  ;;  %v850_v32 = vsub.f32 %v4353_v8, %v4374_v55  ;;  %v4411_v25 = vand.u32 4294901760, %v4389_v35 }
  0x6e   :  { %680 = vmatprep.subr.mxu1 %v4114_v16  ;;  %3623 = vmatprep.subr.mxu0 %v4017_v0  ;;  %v4404_v2 = vand.u32 4294901760, %v843_v63 }
  0x6f   :  { %682 = vmatpush1.msra.mxu1 %v4120_v20  ;;  %3624 = vmatpush3.msra.mxu0 %v4321_v54  ;;  %v4417_v63 = vand.u32 4294901760, %v850_v32  ;;  %v871_v60 = vsub.f32 %v4389_v35, %v4411_v25  ;;  %v4434_v32 = vand.u32 4294901760, %v864_v61 }
  0x70   :  { %684 = vmatprep.subr.mxu1 %v4122_v21  ;;  %3625 = vmatprep.subr.mxu0 %v4017_v0 }
  0x71   :  { %686 = vmatpush1.msra.mxu1 %v4137_v26  ;;  %3626 = vmatpush3.msra.mxu0 %v4332_v13 }
  0x72   :  { %688 = vmatprep.subr.mxu1 %v4149_v31  ;;  %3627 = vmatprep.subr.mxu0 %v4017_v0 }
  0x73   :  { %690 = vmatpush1.msra.mxu1 %v4171_v40  ;;  %723 = vmatprep.mubr.f32.mxu1 %v4017_v0 }
  0x74   :  { %3628 = vmatpush3.msra.mxu0 %v4341_v24  ;;  %725 = vmatmul.mubr.f32.vlgmr.msra.gmra.mxu1 %v4164_v37 }
  0x75   :  { %3629 = vmatprep.subr.mxu0 %v4017_v0  ;;  %3636 = vmatprep.subr.mxu1 %v4017_v0 }
  0x76   :  { %3630 = vmatpush3.msra.mxu0 %v4350_v43  ;;  %3637 = vmatpush3.msra.mxu1 %v4393_v14  ;;  %v4426_v14 = vand.u32 4294901760, %v857_v58  ;;  %v4440_v58 = vand.u32 4294901760, %v871_v60  ;;  %v1251_v60 = vld [vmem:[#allocation8] sm:$0xf] }
  0x77   :  { %3631 = vmatprep.subr.mxu0 %v4017_v0  ;;  %3638 = vmatprep.subr.mxu1 %v4017_v0 }
  0x78   :  { %3632 = vmatpush3.msra.mxu0 %v4362_v1  ;;  %3639 = vmatpush3.msra.mxu1 %v4404_v2 }
  0x79   :  { %3633 = vmatprep.mubr.msk.f32.mxu0 %vm4018_vm1, %v4017_v0  ;;  %3640 = vmatprep.subr.mxu1 %v4017_v0 }
  0x7a   :  { %3651 = vmatprep.subr.mxu0 %v4017_v0  ;;  %3634 = vmatmul.mubr.f32.vlgmr.msra.gmra.mxu0 %v4249_v3 }
  0x7b   :  { %3641 = vmatpush3.msra.mxu1 %v4417_v63  ;;  %3652 = vmatpush3.msra.mxu0 %v4328_v7 }
  0x7c   :  { %3642 = vmatprep.subr.mxu1 %v4017_v0  ;;  %3653 = vmatprep.subr.mxu0 %v4017_v0 }
  0x7d   :  { %3643 = vmatpush3.msra.mxu1 %v4426_v14  ;;  %3654 = vmatpush3.msra.mxu0 %v4337_v19 }
  0x7e   :  { %3644 = vmatprep.subr.mxu1 %v4017_v0  ;;  %3655 = vmatprep.subr.mxu0 %v4017_v0 }
  0x7f   :  { %3645 = vmatpush3.msra.mxu1 %v4434_v32  ;;  %3656 = vmatpush3.msra.mxu0 %v4353_v8 }
  0x80   :  { %3646 = vmatprep.subr.mxu1 %v4017_v0  ;;  %3657 = vmatprep.subr.mxu0 %v4017_v0 }
  0x81   :  { %3647 = vmatpush3.msra.mxu1 %v4440_v58  ;;  %3648 = vmatprep.mubr.msk.f32.mxu1 %vm4018_vm1, %v4017_v0 }
  0x82   :  { %3658 = vmatpush3.msra.mxu0 %v4365_v59  ;;  %3649 = vmatmul.mubr.f32.vlgmr.msra.gmra.mxu1 %v4164_v37 }
  0x83   :  { %3659 = vmatprep.subr.mxu0 %v4017_v0  ;;  %3666 = vmatprep.subr.mxu1 %v4017_v0 }
  0x84   :  { %3660 = vmatpush3.msra.mxu0 %v4377_v48  ;;  %3667 = vmatpush3.msra.mxu1 %v4315_v44 }
  0x85   :  { %3661 = vmatprep.subr.mxu0 %v4017_v0  ;;  %3668 = vmatprep.subr.mxu1 %v4017_v0 }
  0x86   :  { %3662 = vmatpush3.msra.mxu0 %v4389_v35  ;;  %3663 = vmatprep.mubr.msk.f32.mxu0 %vm4018_vm1, %v4017_v0 }
  0x87   :  { %3669 = vmatpush3.msra.mxu1 %v4321_v54  ;;  %3664 = vmatmul.mubr.f32.vlgmr.msra.gmra.mxu0 %v4184_v45  ;;  %v1253_v45 = vsel %vm132_vm0, %v1251_v60, 0 }
  0x88   :  { %3670 = vmatprep.subr.mxu1 %v4017_v0  ;;  %3681 = vmatprep.subr.mxu0 %v4017_v0  ;;  %v4482_v61 = vand.u32 4294901760, %v1253_v45 }
  0x89   :  { %3671 = vmatpush3.msra.mxu1 %v4332_v13  ;;  %3682 = vmatpush3.msra.mxu0 %v4346_v39 }
  0x8a   :  { %3672 = vmatprep.subr.mxu1 %v4017_v0  ;;  %3683 = vmatprep.subr.mxu0 %v4017_v0  ;;  %v4496_v3 = vsub.f32 %v1253_v45, %v4482_v61 }
  0x8b   :  { %3673 = vmatpush3.msra.mxu1 %v4341_v24  ;;  %3684 = vmatpush3.msra.mxu0 %v4358_v9 }
  0x8c   :  { %3674 = vmatprep.subr.mxu1 %v4017_v0  ;;  %3685 = vmatprep.subr.mxu0 %v4017_v0 }
  0x8d   :  { %3675 = vmatpush3.msra.mxu1 %v4350_v43  ;;  %3686 = vmatpush3.msra.mxu0 %v4374_v55 }
  0x8e   :  { %3676 = vmatprep.subr.mxu1 %v4017_v0  ;;  %3687 = vmatprep.subr.mxu0 %v4017_v0 }
  0x8f   :  { %3677 = vmatpush3.msra.mxu1 %v4362_v1  ;;  %3678 = vmatprep.mubr.msk.f32.mxu1 %vm4018_vm1, %v4017_v0 }
  0x90   :  { %3688 = vmatpush3.msra.mxu0 %v4386_v36  ;;  %3679 = vmatmul.mubr.f32.vlgmr.msra.gmra.mxu1 %v4204_v52  ;;  %v4507_v52 = vand.u32 4294901760, %v4496_v3 }
  0x91   :  { %3689 = vmatprep.subr.mxu0 %v4017_v0  ;;  %3696 = vmatprep.subr.mxu1 %v4017_v0 }
  0x92   :  { %3690 = vmatpush3.msra.mxu0 %v4400_v30  ;;  %3697 = vmatpush3.msra.mxu1 %v4315_v44  ;;  %v1335_v60 = vsub.f32 %v4496_v3, %v4507_v52 }
  0x93   :  { %3691 = vmatprep.subr.mxu0 %v4017_v0  ;;  %3698 = vmatprep.subr.mxu1 %v4017_v0 }
  0x94   :  { %3692 = vmatpush3.msra.mxu0 %v4411_v25  ;;  %3693 = vmatprep.mubr.msk.f32.mxu0 %vm4018_vm1, %v4017_v0  ;;  %v4528_v45 = vand.u32 4294901760, %v1335_v60 }
  0x95   :  { %3699 = vmatpush3.msra.mxu1 %v4321_v54  ;;  %3694 = vmatmul.mubr.f32.vlgmr.msra.gmra.mxu0 %v4164_v37 }
  0x96   :  { %3700 = vmatprep.subr.mxu1 %v4017_v0  ;;  %1276 = vmatprep.subr.mxu0 %v4101_v4 }
  0x97   :  { %3701 = vmatpush3.msra.mxu1 %v4332_v13  ;;  %1278 = vmatpush1.msra.mxu0 %v4103_v5 }
  0x98   :  { %3702 = vmatprep.subr.mxu1 %v4017_v0  ;;  %1280 = vmatprep.subr.mxu0 %v4105_v6 }
  0x99   :  { %3703 = vmatpush3.msra.mxu1 %v4341_v24  ;;  %1282 = vmatpush1.msra.mxu0 %v4107_v10 }
  0x9a   :  { %3704 = vmatprep.subr.mxu1 %v4017_v0  ;;  %1284 = vmatprep.subr.mxu0 %v4109_v11 }
  0x9b   :  { %3705 = vmatpush3.msra.mxu1 %v4350_v43  ;;  %1286 = vmatpush1.msra.mxu0 %v4112_v15 }
  0x9c   :  { %3706 = vmatprep.subr.mxu1 %v4017_v0  ;;  %1288 = vmatprep.subr.mxu0 %v4114_v16 }
  0x9d   :  { %3707 = vmatpush3.msra.mxu1 %v4362_v1  ;;  %3708 = vmatprep.mubr.msk.f32.mxu1 %vm4018_vm1, %v4017_v0 }
  0x9e   :  { %1290 = vmatpush1.msra.mxu0 %v4120_v20  ;;  %3709 = vmatmul.mubr.f32.vlgmr.msra.gmra.mxu1 %v4164_v37  ;;  %v5033_v37 = vld [vmem:[#allocation26_spill] sm:$0xff] }
  0x9f   :  { %1292 = vmatprep.subr.mxu0 %v4122_v21  ;;  %1368 = vmatprep.subr.mxu1 %v4177_v42  ;;  %v5035_v42 = vld [vmem:[#allocation28_spill] sm:$0xff] }
  0xa0   :  { %1294 = vmatpush1.msra.mxu0 %v4137_v26  ;;  %1374 = vmatpush1.msra.mxu1 %v4187_v46  ;;  %v5036_v46 = vld [vmem:[#allocation29_spill] sm:$0xff] }
  0xa1   :  { %1296 = vmatprep.subr.mxu0 %v4149_v31  ;;  %1380 = vmatprep.subr.mxu1 %v4189_v47  ;;  %v5037_v47 = vld [vmem:[#allocation30_spill] sm:$0xff] }
  0xa2   :  { %1298 = vmatpush1.msra.mxu0 %v4171_v40  ;;  %1386 = vmatpush1.msra.mxu1 %v4199_v50  ;;  %v5039_v50 = vld [vmem:[#allocation34_spill] sm:$0xff] }
  0xa3   :  { %1331 = vmatprep.mubr.f32.mxu0 %v4017_v0  ;;  %1392 = vmatprep.subr.mxu1 %v4201_v51  ;;  %v5040_v51 = vld [vmem:[#allocation35_spill] sm:$0xff] }
  0xa4   :  { %1497 = vmatprep.subr.mxu0 %v4117_v17  ;;  %1337 = vmatmul.mubr.f32.vlgmr.msra.gmra.mxu0 %v4528_v45  ;;  %v5028_v17 = vld [vmem:[#allocation31_spill] sm:$0xff] }
  0xa5   :  { %1398 = vmatpush1.msra.mxu1 %v4237_v62  ;;  %1500 = vmatpush1.msra.mxu0 %v4125_v22  ;;  %v5029_v22 = vld [vmem:[#allocation32_spill] sm:$0xff]  ;;  %v115_v62 = vld [vmem:[#allocation5] sm:$0xff] }
  0xa6   :  { %1404 = vmatprep.subr.mxu1 %v4260_v12  ;;  %1503 = vmatprep.subr.mxu0 %v4128_v23  ;;  %v5030_v23 = vld [vmem:[#allocation23_spill] sm:$0xff] }
  0xa7   :  { %1410 = vmatpush1.msra.mxu1 %v4267_v18  ;;  %1506 = vmatpush1.msra.mxu0 %v4140_v28  ;;  %v5031_v28 = vld [vmem:[#allocation24_spill] sm:$0xff] }
  0xa8   :  { %1416 = vmatprep.subr.mxu1 %v4275_v27  ;;  %1509 = vmatprep.subr.mxu0 %v4143_v29  ;;  %v5032_v29 = vld [vmem:[#allocation25_spill] sm:$0xff] }
  0xa9   :  { %1422 = vmatpush1.msra.mxu1 %v4277_v33  ;;  %1512 = vmatpush1.msra.mxu0 %v4174_v41  ;;  %v5034_v41 = vld [vmem:[#allocation27_spill] sm:$0xff]  ;;  %v4710_v33 = vand.u32 4294901760, %v115_v62 }
  0xaa   :  { %1428 = vmatprep.subr.mxu1 %v4281_v34  ;;  %1515 = vmatprep.subr.mxu0 %v4195_v49  ;;  %v5038_v49 = vld [vmem:[#allocation33_spill] sm:$0xff] }
  0xab   :  { %1434 = vmatpush1.msra.mxu1 %v4283_v38  ;;  %1467 = vmatprep.mubr.f32.mxu1 %v4017_v0 }
  0xac   :  { %1518 = vmatpush1.msra.mxu0 %v4207_v53  ;;  %1469 = vmatmul.mubr.f32.vlgmr.msra.gmra.mxu1 %v4482_v61  ;;  %v5041_v53 = vld [vmem:[#allocation36_spill] sm:$0xff] }
  0xad   :  { %1521 = vmatprep.subr.mxu0 %v4217_v56  ;;  %1593 = vmatprep.subr.mxu1 %v4101_v4  ;;  %v116_v56 = vld [vmem:[#allocation5 + $0x8] sm:$0xff] }
  0xae   :  { %1524 = vmatpush1.msra.mxu0 %v4220_v57  ;;  %1595 = vmatpush1.msra.mxu1 %v4103_v5  ;;  %v4699_v12 = vand.u32 4294901760, %v116_v56 }
  0xaf   :  { %1527 = vmatprep.subr.mxu0 %v5028_v17  ;;  %1597 = vmatprep.subr.mxu1 %v4105_v6 }
  0xb0   :  { %1530 = vmatpush1.msra.mxu0 %v5029_v22  ;;  %1563 = vmatprep.mubr.f32.mxu0 %v4017_v0 }
  0xb1   :  { %1599 = vmatpush1.msra.mxu1 %v4107_v10  ;;  %1566 = vmatmul.mubr.f32.vlgmr.msra.gmra.mxu0 %v4496_v3 }
  0xb2   :  { %1601 = vmatprep.subr.mxu1 %v4109_v11  ;;  %1681 = vmatprep.subr.mxu0 %v5030_v23 }
  0xb3   :  { %1603 = vmatpush1.msra.mxu1 %v4112_v15  ;;  %1685 = vmatpush1.msra.mxu0 %v5031_v28 }
  0xb4   :  { %1605 = vmatprep.subr.mxu1 %v4114_v16  ;;  %1689 = vmatprep.subr.mxu0 %v5032_v29 }
  0xb5   :  { %1607 = vmatpush1.msra.mxu1 %v4120_v20  ;;  %1693 = vmatpush1.msra.mxu0 %v5033_v37 }
  0xb6   :  { %1609 = vmatprep.subr.mxu1 %v4122_v21  ;;  %1697 = vmatprep.subr.mxu0 %v5034_v41 }
  0xb7   :  { %1611 = vmatpush1.msra.mxu1 %v4137_v26  ;;  %1701 = vmatpush1.msra.mxu0 %v5035_v42  ;;  %v130_v42 = vld [vmem:[#allocation7 + $0x38] sm:$0xff] }
  0xb8   :  { %1613 = vmatprep.subr.mxu1 %v4149_v31  ;;  %1705 = vmatprep.subr.mxu0 %v5036_v46  ;;  %v2925_v46 = vld [vmem:[#allocation10] sm:$0xf] }
  0xb9   :  { %1615 = vmatpush1.msra.mxu1 %v4171_v40  ;;  %1648 = vmatprep.mubr.f32.mxu1 %v4017_v0 }
  0xba   :  { %1709 = vmatpush1.msra.mxu0 %v5037_v47  ;;  %1652 = vmatmul.mubr.f32.vlgmr.msra.gmra.mxu1 %v4507_v52  ;;  %v129_v47 = vld [vmem:[#allocation7 + $0x30] sm:$0xff] }
  0xbb   :  { %1713 = vmatprep.subr.mxu0 %v5038_v49  ;;  %1787 = vmatprep.subr.mxu1 %v4101_v4  ;;  %v5042_v4 = vld [vmem:[#allocation37_spill] sm:$0xff]  ;;  %v128_v49 = vld [vmem:[#allocation7 + $0x28] sm:$0xff] }
  0xbc   :  { %1717 = vmatpush1.msra.mxu0 %v5039_v50  ;;  %1789 = vmatpush1.msra.mxu1 %v4103_v5  ;;  %v122_v5 = vld [vmem:[#allocation5 + $0x38] sm:$0xff]  ;;  %v4796_v50 = vand.u32 4294901760, %v130_v42 }
  0xbd   :  { %1721 = vmatprep.subr.mxu0 %v5040_v51  ;;  %1791 = vmatprep.subr.mxu1 %v4105_v6  ;;  %v2369_v6 = vld [vmem:[%s4992_s5] sm:$0xf]  ;;  %v2927_v51 = vsel %vm2370_vm2, %v2925_v46, 0  ;;  %s4019_s5 = smov [#allocation11]  }
  0xbe   :  { %1725 = vmatpush1.msra.mxu0 %v5041_v53  ;;  %1758 = vmatprep.mubr.f32.mxu0 %v4017_v0  ;;  %v4801_v53 = vand.u32 4294901760, %v129_v47  ;;  %s3485_s17 = sshll.u32 %s4019_s5, 4  ;;  %s3486_s17 = int_to_ptr.vmem [resolvable:$true] %s3485_s17 }
  0xbf   :  { %1793 = vmatpush1.msra.mxu1 %v4107_v10  ;;  %1760 = vmatmul.mubr.f32.vlgmr.msra.gmra.mxu0 %v4482_v61  ;;  %v121_v10 = vld [vmem:[#allocation5 + $0x30] sm:$0xff]  ;;  %s3916_s21 = scalar_lea.vmem %s3486_s17, 192  ;;  %p3921_p12 = scmp.lt.s32.totalorder %s3486_s17, %s3486_s17 }
  0xc0   :  { %1795 = vmatprep.subr.mxu1 %v4109_v11  ;;  %3711 = vmatprep.subr.mxu0 %v4017_v0  ;;  %v120_v11 = vld [vmem:[#allocation5 + $0x28] sm:$0xff]  ;;  %p3917_p11 = scmp.ne.s32.totalorder %s3486_s17, %s3916_s21  ;;  %p3922_p13 = scmp.lt.s32.totalorder %s3916_s21, %s3916_s21 }
  0xc1   :  { %1797 = vmatpush1.msra.mxu1 %v4112_v15  ;;  %3712 = vmatpush3.msra.mxu0 %v4315_v44  ;;  %v4660_v15 = vand.u32 4294901760, %v122_v5 }
  0xc2   :  { %1799 = vmatprep.subr.mxu1 %v4114_v16  ;;  %3713 = vmatprep.subr.mxu0 %v4017_v0  ;;  %v2372_v16 = vsel %vm2370_vm2, %v2369_v6, 0  ;;  %v126_v6 = vld [vmem:[#allocation7 + $0x18] sm:$0xff]  ;;  %p3923_p0 = por %p3922_p13, %p3921_p12 }
  0xc3   :  { %1801 = vmatpush1.msra.mxu1 %v4120_v20  ;;  %3714 = vmatpush3.msra.mxu0 %v4321_v54  ;;  %v4665_v20 = vand.u32 4294901760, %v121_v10  ;;  %v4680_v57 = vsub.f32 %v122_v5, %v4660_v15  ;;  %v4805_v5 = vand.u32 4294901760, %v128_v49 }
  0xc4   :  { %1803 = vmatprep.subr.mxu1 %v4122_v21  ;;  %3715 = vmatprep.subr.mxu0 %v4017_v0  ;;  %v119_v21 = vld [vmem:[#allocation5 + $0x20] sm:$0xff]  ;;  %p3924_p1 = pnand %p3923_p0, %p3917_p11 }
  0xc5   :  { %1805 = vmatpush1.msra.mxu1 %v4137_v26  ;;  %3716 = vmatpush3.msra.mxu0 %v4332_v13  ;;  %v4669_v26 = vand.u32 4294901760, %v120_v11  ;;  %v2484_v27 = vand.u32 4294901760, %v4680_v57 }
  0xc6   :  { %1807 = vmatprep.subr.mxu1 %v4149_v31  ;;  %3717 = vmatprep.subr.mxu0 %v4017_v0  ;;  %v118_v31 = vld [vmem:[#allocation5 + $0x18] sm:$0xff] }
  0xc7   :  { %1809 = vmatpush1.msra.mxu1 %v4171_v40  ;;  %1842 = vmatprep.mubr.f32.mxu1 %v4017_v0  ;;  %v4673_v40 = vand.u32 4294901760, %v2372_v16 }
  0xc8   :  { %3718 = vmatpush3.msra.mxu0 %v4341_v24  ;;  %1844 = vmatmul.mubr.f32.vlgmr.msra.gmra.mxu1 %v4482_v61 }
  0xc9   :  { %3719 = vmatprep.subr.mxu0 %v4017_v0  ;;  %3726 = vmatprep.subr.mxu1 %v4017_v0  ;;  %v4702_v18 = vsub.f32 %v2372_v16, %v4673_v40 }
  0xca   :  { %3720 = vmatpush3.msra.mxu0 %v4350_v43  ;;  %3727 = vmatpush3.msra.mxu1 %v5042_v4  ;;  %v127_v4 = vld [vmem:[#allocation7 + $0x20] sm:$0xff] }
  0xcb   :  { %3721 = vmatprep.subr.mxu0 %v4017_v0  ;;  %3728 = vmatprep.subr.mxu1 %v4017_v0  ;;  %v4815_v16 = vand.u32 4294901760, %v127_v4 }
  0xcc   :  { %3722 = vmatpush3.msra.mxu0 %v4362_v1  ;;  %3729 = vmatpush3.msra.mxu1 %v4404_v2 }
  0xcd   :  { %3723 = vmatprep.mubr.msk.f32.mxu0 %vm4018_vm1, %v4017_v0  ;;  %3730 = vmatprep.subr.mxu1 %v4017_v0 }
  0xce   :  { %3741 = vmatprep.subr.mxu0 %v4017_v0  ;;  %3724 = vmatmul.mubr.f32.vlgmr.msra.gmra.mxu0 %v4528_v45 }
  0xcf   :  { %3731 = vmatpush3.msra.mxu1 %v4417_v63  ;;  %3742 = vmatpush3.msra.mxu0 %v4328_v7  ;;  %v2449_v7 = vand.u32 4294901760, %v4702_v18 }
  0xd0   :  { %3732 = vmatprep.subr.mxu1 %v4017_v0  ;;  %3743 = vmatprep.subr.mxu0 %v4017_v0 }
  0xd1   :  { %3733 = vmatpush3.msra.mxu1 %v4426_v14  ;;  %3744 = vmatpush3.msra.mxu0 %v4337_v19  ;;  %v4729_v19 = vsub.f32 %v116_v56, %v4699_v12  ;;  %v4826_v56 = vand.u32 4294901760, %v126_v6 }
  0xd2   :  { %3734 = vmatprep.subr.mxu1 %v4017_v0  ;;  %3745 = vmatprep.subr.mxu0 %v4017_v0 }
  0xd3   :  { %3735 = vmatpush3.msra.mxu1 %v4434_v32  ;;  %3746 = vmatpush3.msra.mxu0 %v4353_v8 }
  0xd4   :  { %3736 = vmatprep.subr.mxu1 %v4017_v0  ;;  %3747 = vmatprep.subr.mxu0 %v4017_v0 }
  0xd5   :  { %3737 = vmatpush3.msra.mxu1 %v4440_v58  ;;  %3738 = vmatprep.mubr.msk.f32.mxu1 %vm4018_vm1, %v4017_v0  ;;  %v2520_v58 = vand.u32 4294901760, %v4729_v19 }
  0xd6   :  { %3748 = vmatpush3.msra.mxu0 %v4365_v59  ;;  %3739 = vmatmul.mubr.f32.vlgmr.msra.gmra.mxu1 %v4482_v61  ;;  %v4688_v59 = vand.u32 4294901760, %v118_v31 }
  0xd7   :  { %3749 = vmatprep.subr.mxu0 %v4017_v0  ;;  %3756 = vmatprep.subr.mxu1 %v4017_v0  ;;  %v2521_v23 = vsub.f32 %v4729_v19, %v2520_v58 }
  0xd8   :  { %3750 = vmatpush3.msra.mxu0 %v4377_v48  ;;  %3757 = vmatpush3.msra.mxu1 %v4315_v44  ;;  %v4677_v48 = vand.u32 4294901760, %v119_v21  ;;  %v4716_v38 = vsub.f32 %v118_v31, %v4688_v59  ;;  %v4818_v31 = vsub.f32 %v130_v42, %v4796_v50 }
  0xd9   :  { %3751 = vmatprep.subr.mxu0 %v4017_v0  ;;  %3758 = vmatprep.subr.mxu1 %v4017_v0  ;;  %v2522_v41 = vand.u32 4294901760, %v2521_v23 }
  0xda   :  { %3752 = vmatpush3.msra.mxu0 %v4389_v35  ;;  %3753 = vmatprep.mubr.msk.f32.mxu0 %vm4018_vm1, %v4017_v0  ;;  %v117_v35 = vld [vmem:[#allocation5 + $0x10] sm:$0xff]  ;;  %v2508_v2 = vand.u32 4294901760, %v4716_v38 }
  0xdb   :  { %3759 = vmatpush3.msra.mxu1 %v4321_v54  ;;  %3754 = vmatmul.mubr.f32.vlgmr.msra.gmra.mxu0 %v4496_v3  ;;  %v4692_v8 = vand.u32 4294901760, %v117_v35 }
  0xdc   :  { %3760 = vmatprep.subr.mxu1 %v4017_v0  ;;  %3771 = vmatprep.subr.mxu0 %v4017_v0  ;;  %v2509_v45 = vsub.f32 %v4716_v38, %v2508_v2 }
  0xdd   :  { %3761 = vmatpush3.msra.mxu1 %v4332_v13  ;;  %3772 = vmatpush3.msra.mxu0 %v4346_v39  ;;  %v4737_v39 = vsub.f32 %v115_v62, %v4710_v33  ;;  %v4834_v62 = vsub.f32 %v128_v49, %v4805_v5 }
  0xde   :  { %3762 = vmatprep.subr.mxu1 %v4017_v0  ;;  %3773 = vmatprep.subr.mxu0 %v4017_v0  ;;  %v2510_v37 = vand.u32 4294901760, %v2509_v45 }
  0xdf   :  { %3763 = vmatpush3.msra.mxu1 %v4341_v24  ;;  %3774 = vmatpush3.msra.mxu0 %v4358_v9  ;;  %v4695_v9 = vsub.f32 %v120_v11, %v4669_v26  ;;  %v2526_v60 = vand.u32 4294901760, %v4737_v39  ;;  %v4810_v11 = vand.u32 4294901760, %v2927_v51 }
  0xe0   :  { %3764 = vmatprep.subr.mxu1 %v4017_v0  ;;  %3775 = vmatprep.subr.mxu0 %v4017_v0 }
  0xe1   :  { %3765 = vmatpush3.msra.mxu1 %v4350_v43  ;;  %3776 = vmatpush3.msra.mxu0 %v4374_v55  ;;  %v4686_v55 = vsub.f32 %v121_v10, %v4665_v20  ;;  %v2527_v29 = vsub.f32 %v4737_v39, %v2526_v60  ;;  %v125_v10 = vld [vmem:[#allocation7 + $0x10] sm:$0xff] }
  0xe2   :  { %3766 = vmatprep.subr.mxu1 %v4017_v0  ;;  %3777 = vmatprep.subr.mxu0 %v4017_v0 }
  0xe3   :  { %3767 = vmatpush3.msra.mxu1 %v4362_v1  ;;  %3768 = vmatprep.mubr.msk.f32.mxu1 %vm4018_vm1, %v4017_v0  ;;  %v2490_v34 = vand.u32 4294901760, %v4686_v55 }
  0xe4   :  { %3778 = vmatpush3.msra.mxu0 %v4386_v36  ;;  %3769 = vmatmul.mubr.f32.vlgmr.msra.gmra.mxu1 %v4507_v52  ;;  %v4707_v36 = vsub.f32 %v119_v21, %v4677_v48  ;;  %v124_v21 = vld [vmem:[#allocation7 + $0x8] sm:$0xff] }
  0xe5   :  { %3779 = vmatprep.subr.mxu0 %v4017_v0  ;;  %3786 = vmatprep.subr.mxu1 %v4017_v0  ;;  %v2491_v14 = vsub.f32 %v4686_v55, %v2490_v34 }
  0xe6   :  { %3780 = vmatpush3.msra.mxu0 %v4400_v30  ;;  %3787 = vmatpush3.msra.mxu1 %v4315_v44  ;;  %v4722_v30 = vsub.f32 %v117_v35, %v4692_v8  ;;  %v2496_v44 = vand.u32 4294901760, %v4695_v9  ;;  %v4824_v35 = vsub.f32 %v129_v47, %v4801_v53 }
  0xe7   :  { %3781 = vmatprep.subr.mxu0 %v4017_v0  ;;  %3788 = vmatprep.subr.mxu1 %v4017_v0 }
  0xe8   :  { %3782 = vmatpush3.msra.mxu0 %v4411_v25  ;;  %3783 = vmatprep.mubr.msk.f32.mxu0 %vm4018_vm1, %v4017_v0  ;;  %v2485_v25 = vsub.f32 %v4680_v57, %v2484_v27  ;;  %v2497_v63 = vsub.f32 %v4695_v9, %v2496_v44  ;;  %v2514_v32 = vand.u32 4294901760, %v4722_v30 }
  0xe9   :  { %3789 = vmatpush3.msra.mxu1 %v4321_v54  ;;  %3784 = vmatmul.mubr.f32.vlgmr.msra.gmra.mxu0 %v4482_v61  ;;  %v2502_v54 = vand.u32 4294901760, %v4707_v36 }
  0xea   :  { %3790 = vmatprep.subr.mxu1 %v4017_v0  ;;  %2399 = vmatprep.subr.mxu0 %v4660_v15  ;;  %v2486_v3 = vand.u32 4294901760, %v2485_v25  ;;  %v2498_v17 = vand.u32 4294901760, %v2497_v63  ;;  %v2515_v22 = vsub.f32 %v4722_v30, %v2514_v32  ;;  %v4858_v25 = vsub.f32 %v126_v6, %v4826_v56 }
  0xeb   :  { %3791 = vmatpush3.msra.mxu1 %v4332_v13  ;;  %2401 = vmatpush1.msra.mxu0 %v4665_v20  ;;  %v2450_v13 = vsub.f32 %v4702_v18, %v2449_v7  ;;  %v2503_v52 = vsub.f32 %v4707_v36, %v2502_v54 }
  0xec   :  { %3792 = vmatprep.subr.mxu1 %v4017_v0  ;;  %2403 = vmatprep.subr.mxu0 %v4669_v26 }
  0xed   :  { %3793 = vmatpush3.msra.mxu1 %v4341_v24  ;;  %2405 = vmatpush1.msra.mxu0 %v4677_v48  ;;  %v2492_v24 = vand.u32 4294901760, %v2491_v14  ;;  %v2504_v28 = vand.u32 4294901760, %v2503_v52  ;;  %v3051_v14 = vand.u32 4294901760, %v4834_v62 }
  0xee   :  { %3794 = vmatprep.subr.mxu1 %v4017_v0  ;;  %2407 = vmatprep.subr.mxu0 %v4688_v59 }
  0xef   :  { %3795 = vmatpush3.msra.mxu1 %v4350_v43  ;;  %3798 = vmatprep.mubr.msk.f32.mxu1 %vm4018_vm1, %v4017_v0  ;;  %v2451_v43 = vand.u32 4294901760, %v2450_v13 }
  0xf0   :  { %3796 = vmatprep.subr.mxu1 %v4017_v0  ;;  %2409 = vmatpush1.msra.mxu0 %v4692_v8 }
  0xf1   :  { %3797 = vmatpush3.msra.mxu1 %v4362_v1  ;;  %2411 = vmatprep.subr.mxu0 %v4699_v12  ;;  %v2516_v1 = vand.u32 4294901760, %v2515_v22 }
  0xf2   :  { %3799 = vmatmul.mubr.f32.vlgmr.msra.gmra.mxu1 %v4482_v61  ;;  %2487 = vmatprep.subr.mxu1 %v2486_v3  ;;  %v2528_v61 = vand.u32 4294901760, %v2527_v29 }
  0xf3   :  { %2413 = vmatpush1.msra.mxu0 %v4710_v33  ;;  %2493 = vmatpush1.msra.mxu1 %v2492_v24 }
  0xf4   :  { %2446 = vmatprep.mubr.f32.mxu0 %v4017_v0  ;;  %2499 = vmatprep.subr.mxu1 %v2498_v17 }
  0xf5   :  { %2596 = vmatprep.subr.mxu0 %v4680_v57  ;;  %2452 = vmatmul.mubr.f32.vlgmr.msra.gmra.mxu0 %v2451_v43  ;;  %v123_v57 = vld [vmem:[#allocation7] sm:$0xff] }
  0xf6   :  { %2505 = vmatpush1.msra.mxu1 %v2504_v28  ;;  %2599 = vmatpush1.msra.mxu0 %v4686_v55  ;;  %v4831_v55 = vand.u32 4294901760, %v125_v10 }
  0xf7   :  { %2511 = vmatprep.subr.mxu1 %v2510_v37  ;;  %2602 = vmatprep.subr.mxu0 %v4695_v9  ;;  %v4839_v9 = vand.u32 4294901760, %v124_v21 }
  0xf8   :  { %2517 = vmatpush1.msra.mxu1 %v2516_v1  ;;  %2605 = vmatpush1.msra.mxu0 %v4707_v36  ;;  %v4847_v36 = vsub.f32 %v127_v4, %v4815_v16 }
  0xf9   :  { %2523 = vmatprep.subr.mxu1 %v2522_v41  ;;  %2608 = vmatprep.subr.mxu0 %v4716_v38  ;;  %v3045_v38 = vand.u32 4294901760, %v4824_v35 }
  0xfa   :  { %2529 = vmatpush1.msra.mxu1 %v2528_v61  ;;  %2562 = vmatprep.mubr.f32.mxu1 %v4017_v0 }
  0xfb   :  { %2611 = vmatpush1.msra.mxu0 %v4722_v30  ;;  %2564 = vmatmul.mubr.f32.vlgmr.msra.gmra.mxu1 %v4673_v40  ;;  %v4872_v30 = vsub.f32 %v124_v21, %v4839_v9 }
  0xfc   :  { %2614 = vmatprep.subr.mxu0 %v4729_v19  ;;  %2684 = vmatprep.subr.mxu1 %v4660_v15  ;;  %v3057_v19 = vand.u32 4294901760, %v4847_v36 }
  0xfd   :  { %2617 = vmatpush1.msra.mxu0 %v4737_v39  ;;  %2650 = vmatprep.mubr.f32.mxu0 %v4017_v0  ;;  %v3046_v39 = vsub.f32 %v4824_v35, %v3045_v38 }
  0xfe   :  { %2686 = vmatpush1.msra.mxu1 %v4665_v20  ;;  %2653 = vmatmul.mubr.f32.vlgmr.msra.gmra.mxu0 %v4702_v18  ;;  %v3058_v13 = vsub.f32 %v4847_v36, %v3057_v19 }
  0xff   :  { %2688 = vmatprep.subr.mxu1 %v4669_v26  ;;  %2768 = vmatprep.subr.mxu0 %v2484_v27  ;;  %v4842_v27 = vsub.f32 %v2927_v51, %v4810_v11 }
 0x100   :  { %2690 = vmatpush1.msra.mxu1 %v4677_v48  ;;  %2772 = vmatpush1.msra.mxu0 %v2490_v34  ;;  %v3039_v34 = vand.u32 4294901760, %v4818_v31 }
 0x101   :  { %2692 = vmatprep.subr.mxu1 %v4688_v59  ;;  %2776 = vmatprep.subr.mxu0 %v2496_v44  ;;  %v4850_v44 = vand.u32 4294901760, %v123_v57  ;;  %v3004_v18 = vand.u32 4294901760, %v4842_v27 }
 0x102   :  { %2694 = vmatpush1.msra.mxu1 %v4692_v8  ;;  %2780 = vmatpush1.msra.mxu0 %v2502_v54  ;;  %v4864_v54 = vsub.f32 %v125_v10, %v4831_v55 }
 0x103   :  { %2696 = vmatprep.subr.mxu1 %v4699_v12  ;;  %2784 = vmatprep.subr.mxu0 %v2508_v2  ;;  %v3052_v2 = vsub.f32 %v4834_v62, %v3051_v14 }
 0x104   :  { %2698 = vmatpush1.msra.mxu1 %v4710_v33  ;;  %2731 = vmatprep.mubr.f32.mxu1 %v4017_v0  ;;  %v3069_v63 = vand.u32 4294901760, %v4864_v54 }
 0x105   :  { %2788 = vmatpush1.msra.mxu0 %v2514_v32  ;;  %2735 = vmatmul.mubr.f32.vlgmr.msra.gmra.mxu1 %v2449_v7  ;;  %v4880_v7 = vsub.f32 %v123_v57, %v4850_v44  ;;  %v3075_v32 = vand.u32 4294901760, %v4872_v30 }
 0x106   :  { %2792 = vmatprep.subr.mxu0 %v2520_v58  ;;  %2862 = vmatprep.subr.mxu1 %v4660_v15  ;;  %v3040_v15 = vsub.f32 %v4818_v31, %v3039_v34  ;;  %v3070_v52 = vsub.f32 %v4864_v54, %v3069_v63 }
 0x107   :  { %2796 = vmatpush1.msra.mxu0 %v2526_v60  ;;  %2829 = vmatprep.mubr.f32.mxu0 %v4017_v0  ;;  %v3081_v58 = vand.u32 4294901760, %v4880_v7  ;;  %v3076_v60 = vsub.f32 %v4872_v30, %v3075_v32 }
 0x108   :  { %2864 = vmatpush1.msra.mxu1 %v4665_v20  ;;  %2831 = vmatmul.mubr.f32.vlgmr.msra.gmra.mxu0 %v4673_v40  ;;  %v3063_v20 = vand.u32 4294901760, %v4858_v25  ;;  %v3071_v17 = vand.u32 4294901760, %v3070_v52 }
 0x109   :  { %2866 = vmatprep.subr.mxu1 %v4669_v26  ;;  %2954 = vmatprep.subr.mxu0 %v4796_v50  ;;  %v3005_v26 = vsub.f32 %v4842_v27, %v3004_v18  ;;  %v3082_v24 = vsub.f32 %v4880_v7, %v3081_v58 }
 0x10a   :  { %2868 = vmatpush1.msra.mxu1 %v4677_v48  ;;  %2956 = vmatpush1.msra.mxu0 %v4801_v53  ;;  %v3041_v48 = vand.u32 4294901760, %v3040_v15  ;;  %v3064_v3 = vsub.f32 %v4858_v25, %v3063_v20 }
 0x10b   :  { %2870 = vmatprep.subr.mxu1 %v4688_v59  ;;  %2958 = vmatprep.subr.mxu0 %v4805_v5  ;;  %v3047_v59 = vand.u32 4294901760, %v3046_v39  ;;  %v3083_v22 = vand.u32 4294901760, %v3082_v24 }
 0x10c   :  { %2872 = vmatpush1.msra.mxu1 %v4692_v8  ;;  %2960 = vmatpush1.msra.mxu0 %v4815_v16  ;;  %v3053_v8 = vand.u32 4294901760, %v3052_v2  ;;  %v3065_v45 = vand.u32 4294901760, %v3064_v3 }
 0x10d   :  { %2874 = vmatprep.subr.mxu1 %v4699_v12  ;;  %2962 = vmatprep.subr.mxu0 %v4826_v56  ;;  %v3006_v12 = vand.u32 4294901760, %v3005_v26 }
 0x10e   :  { %2876 = vmatpush1.msra.mxu1 %v4710_v33  ;;  %2909 = vmatprep.mubr.f32.mxu1 %v4017_v0  ;;  %v3059_v33 = vand.u32 4294901760, %v3058_v13 }
 0x10f   :  { %2964 = vmatpush1.msra.mxu0 %v4831_v55  ;;  %2911 = vmatmul.mubr.f32.vlgmr.msra.gmra.mxu1 %v4673_v40  ;;  %v3077_v40 = vand.u32 4294901760, %v3076_v60 }
 0x110   :  { %2966 = vmatprep.subr.mxu0 %v4839_v9  ;;  %3042 = vmatprep.subr.mxu1 %v3041_v48 }
 0x111   :  { %2968 = vmatpush1.msra.mxu0 %v4850_v44  ;;  %3048 = vmatpush1.msra.mxu1 %v3047_v59  ;;  %v219_v43 = vpop.f32.mrf.mxu0 }
 0x112   :  { %3001 = vmatprep.mubr.f32.mxu0 %v4017_v0  ;;  %3054 = vmatprep.subr.mxu1 %v3053_v8 }
 0x113   :  { %3151 = vmatprep.subr.mxu0 %v4818_v31  ;;  %3007 = vmatmul.mubr.f32.vlgmr.msra.gmra.mxu0 %v3006_v12  ;;  %v221_v23 = vpop.f32.mrf.mxu0 }
 0x114   :  { %3060 = vmatpush1.msra.mxu1 %v3059_v33  ;;  %3154 = vmatpush1.msra.mxu0 %v4824_v35 }
 0x115   :  { %3066 = vmatprep.subr.mxu1 %v3065_v45  ;;  %3157 = vmatprep.subr.mxu0 %v4834_v62 }
 0x116   :  { %3072 = vmatpush1.msra.mxu1 %v3071_v17  ;;  %3160 = vmatpush1.msra.mxu0 %v4847_v36 }
 0x117   :  { %3078 = vmatprep.subr.mxu1 %v3077_v40  ;;  %3163 = vmatprep.subr.mxu0 %v4858_v25 }
 0x118   :  { %3084 = vmatpush1.msra.mxu1 %v3083_v22  ;;  %3117 = vmatprep.mubr.f32.mxu1 %v4017_v0  ;;  %v351_v28 = vpop.f32.mrf.mxu1 }
 0x119   :  { %3166 = vmatpush1.msra.mxu0 %v4864_v54  ;;  %3119 = vmatmul.mubr.f32.vlgmr.msra.gmra.mxu1 %v4810_v11  ;;  %v352_v42 = vadd.f32 %v351_v28, %v219_v43 }
 0x11a   :  { %3169 = vmatprep.subr.mxu0 %v4872_v30  ;;  %3239 = vmatprep.subr.mxu1 %v4796_v50  ;;  %v353_v37 = vpop.f32.mrf.mxu1 }
 0x11b   :  { %3172 = vmatpush1.msra.mxu0 %v4880_v7  ;;  %3205 = vmatprep.mubr.f32.mxu0 %v4017_v0  ;;  %v354_v46 = vadd.f32 %v353_v37, %v221_v23 }
 0x11c   :  { %3241 = vmatpush1.msra.mxu1 %v4801_v53  ;;  %3208 = vmatmul.mubr.f32.vlgmr.msra.gmra.mxu0 %v4842_v27 }
 0x11d   :  { %3243 = vmatprep.subr.mxu1 %v4805_v5  ;;  %3323 = vmatprep.subr.mxu0 %v3039_v34  ;;  %v448_v29 = vpop.f32.mrf.mxu0 }
 0x11e   :  { %3245 = vmatpush1.msra.mxu1 %v4815_v16  ;;  %3327 = vmatpush1.msra.mxu0 %v3045_v38  ;;  %v449_v47 = vadd.f32 %v448_v29, %v352_v42 }
 0x11f   :  { %3247 = vmatprep.subr.mxu1 %v4826_v56  ;;  %3331 = vmatprep.subr.mxu0 %v3051_v14  ;;  %v450_v1 = vpop.f32.mrf.mxu0 }
 0x120   :  { %3249 = vmatpush1.msra.mxu1 %v4831_v55  ;;  %3335 = vmatpush1.msra.mxu0 %v3057_v19  ;;  %v451_v49 = vadd.f32 %v450_v1, %v354_v46 }
 0x121   :  { %3251 = vmatprep.subr.mxu1 %v4839_v9  ;;  %3339 = vmatprep.subr.mxu0 %v3063_v20 }
 0x122   :  { %3253 = vmatpush1.msra.mxu1 %v4850_v44  ;;  %3286 = vmatprep.mubr.f32.mxu1 %v4017_v0 }
 0x123   :  { %3343 = vmatpush1.msra.mxu0 %v3069_v63  ;;  %3290 = vmatmul.mubr.f32.vlgmr.msra.gmra.mxu1 %v3004_v18 }
 0x124   :  { %3347 = vmatprep.subr.mxu0 %v3075_v32  ;;  %3417 = vmatprep.subr.mxu1 %v4796_v50 }
 0x125   :  { %3351 = vmatpush1.msra.mxu0 %v3081_v58  ;;  %3384 = vmatprep.mubr.f32.mxu0 %v4017_v0 }
 0x126   :  { %3419 = vmatpush1.msra.mxu1 %v4801_v53  ;;  %3386 = vmatmul.mubr.f32.vlgmr.msra.gmra.mxu0 %v4810_v11  ;;  %v534_v41 = vpop.f32.mrf.mxu1 }
 0x127   :  { %3421 = vmatprep.subr.mxu1 %v4805_v5  ;;  %3464 = vmatprep.mubr.f32.mxu1 %v4017_v0  ;;  %v535_v51 = vadd.f32 %v534_v41, %v449_v47 }
 0x128   :  { %3423 = vmatpush1.msra.mxu1 %v4815_v16  ;;  %v536_v0 = vpop.f32.mrf.mxu1 }
 0x129   :  { %3425 = vmatprep.subr.mxu1 %v4826_v56  ;;  %v537_v53 = vadd.f32 %v536_v0, %v451_v49 }
 0x12a   :  { %3427 = vmatpush1.msra.mxu1 %v4831_v55 }
 0x12b   :  { %3429 = vmatprep.subr.mxu1 %v4839_v9  ;;  %v642_v61 = vpop.f32.mrf.mxu0 }
 0x12c   :  { %3431 = vmatpush1.msra.mxu1 %v4850_v44  ;;  %v643_v5 = vadd.f32 %v642_v61, %v535_v51 }
 0x12d   :  { %3466 = vmatmul.mubr.f32.vlgmr.msra.gmra.mxu1 %v4810_v11  ;;  %v644_v50 = vpop.f32.mrf.mxu0 }
 0x12e   :  { %v645_v6 = vadd.f32 %v644_v50, %v537_v53 }
 0x134   :  { %v726_v4 = vpop.f32.mrf.mxu1 }
 0x135   :  { %v727_v16 = vadd.f32 %v726_v4, %v643_v5 }
 0x136   :  { %v728_v10 = vpop.f32.mrf.mxu1 }
 0x137   :  { %v729_v21 = vadd.f32 %v728_v10, %v645_v6 }
 0x139   :  { %v1244_v31 = vcombine.low %v727_v16, %v729_v21 }
 0x13a   :  { %v808_v35 = vpop.f32.mrf.mxu0 }
 0x13b   :  { %1249 = vst [vmem:[#allocation11] sm:$0xff] %v1244_v31 }
 0x13c   :  { %v3635_v56 = vpop.f32.mrf.mxu0 }
 0x142   :  { %v909_v11 = vpop.f32.mrf.mxu1 }
 0x143   :  { %v910_v34 = vadd.f32 %v909_v11, %v808_v35 }
 0x144   :  { %v3650_v57 = vpop.f32.mrf.mxu1 }
 0x147   :  { %v993_v55 = vpop.f32.mrf.mxu0 }
 0x148   :  { %v994_v38 = vadd.f32 %v993_v55, %v910_v34 }
 0x149   :  { %v3665_v62 = vpop.f32.mrf.mxu0 }
 0x150   :  { %v1072_v9 = vpop.f32.mrf.mxu1 }
 0x151   :  { %v1073_v25 = vadd.f32 %v1072_v9, %v994_v38 }
 0x152   :  { %v3680_v27 = vpop.f32.mrf.mxu1 }
 0x155   :  { %v1161_v36 = vpop.f32.mrf.mxu0 }
 0x156   :  { %v1162_v54 = vadd.f32 %v1161_v36, %v1073_v25 }
 0x157   :  { %v3695_v44 = vpop.f32.mrf.mxu0 }
 0x15e   :  { %v1238_v14 = vpop.f32.mrf.mxu1 }
 0x15f   :  { %v1239_v18 = vadd.f32 %v1238_v14, %v1162_v54 }
 0x160   :  { %v3710_v30 = vpop.f32.mrf.mxu1 }
 0x161   :  { %1250 = vst [vmem:[#allocation11 + $0x8] sm:$0xf] %v1239_v18 }
 0x162   :  { %3927 = shalt.err (!%p3924_p1)
}
 0x163   :  { %3488 = dma.vmem_to_hbm [thread:$0]  %s3486_s17, 192, %s4994_s7, [#allocation4]  }
 0x164   :  { %v1338_v15 = vpop.f32.mrf.mxu0  ;;  %s4020_s7 = smov [#allocation12]  }
 0x165   :  { %s3495_s24 = sshll.u32 %s4020_s7, 4  ;;  %s3496_s24 = int_to_ptr.vmem [resolvable:$true] %s3495_s24 }
 0x166   :  { %v1340_v7 = vpop.f32.mrf.mxu0  ;;  %s3936_s25 = scalar_lea.vmem %s3496_s24, 192  ;;  %p3941_p3 = scmp.lt.s32.totalorder %s3496_s24, %s3496_s24 }
 0x167   :  { %p3937_p2 = scmp.ne.s32.totalorder %s3496_s24, %s3936_s25  ;;  %p3942_p4 = scmp.lt.s32.totalorder %s3936_s25, %s3936_s25 }
 0x169   :  { %p3943_p5 = por %p3942_p4, %p3941_p3 }
 0x16b   :  { %p3944_p6 = pnand %p3943_p5, %p3937_p2 }
 0x16c   :  { %v1470_v19 = vpop.f32.mrf.mxu1 }
 0x16d   :  { %v1471_v32 = vadd.f32 %v1470_v19, %v1338_v15 }
 0x16e   :  { %v1472_v20 = vpop.f32.mrf.mxu1 }
 0x16f   :  { %v1473_v48 = vadd.f32 %v1472_v20, %v1340_v7 }
 0x171   :  { %v1567_v39 = vpop.f32.mrf.mxu0 }
 0x172   :  { %v1568_v58 = vadd.f32 %v1567_v39, %v1471_v32 }
 0x173   :  { %v1569_v2 = vpop.f32.mrf.mxu0 }
 0x174   :  { %v1570_v59 = vadd.f32 %v1569_v2, %v1473_v48 }
 0x17a   :  { %v1653_v63 = vpop.f32.mrf.mxu1 }
 0x17b   :  { %v1654_v8 = vadd.f32 %v1653_v63, %v1568_v58 }
 0x17c   :  { %v1655_v13 = vpop.f32.mrf.mxu1 }
 0x17d   :  { %v1656_v52 = vadd.f32 %v1655_v13, %v1570_v59 }
 0x17f   :  { %v1761_v26 = vpop.f32.mrf.mxu0 }
 0x180   :  { %v1762_v60 = vadd.f32 %v1761_v26, %v1654_v8 }
 0x181   :  { %v1763_v3 = vpop.f32.mrf.mxu0 }
 0x182   :  { %v1764_v33 = vadd.f32 %v1763_v3, %v1656_v52 }
 0x188   :  { %v1845_v12 = vpop.f32.mrf.mxu1 }
 0x189   :  { %v1846_v45 = vadd.f32 %v1845_v12, %v1762_v60 }
 0x18a   :  { %v1847_v24 = vpop.f32.mrf.mxu1 }
 0x18b   :  { %v1848_v17 = vadd.f32 %v1847_v24, %v1764_v33 }
 0x18d   :  { %v2363_v40 = vcombine.low %v1846_v45, %v1848_v17 }
 0x18e   :  { %v1927_v22 = vpop.f32.mrf.mxu0 }
 0x18f   :  { %2367 = vst [vmem:[#allocation12] sm:$0xff] %v2363_v40 }
 0x190   :  { %v3725_v43 = vpop.f32.mrf.mxu0 }
 0x196   :  { %v2028_v23 = vpop.f32.mrf.mxu1 }
 0x197   :  { %v2029_v42 = vadd.f32 %v2028_v23, %v1927_v22 }
 0x198   :  { %v3740_v28 = vpop.f32.mrf.mxu1 }
 0x19b   :  { %v2112_v29 = vpop.f32.mrf.mxu0 }
 0x19c   :  { %v2113_v0 = vadd.f32 %v2112_v29, %v2029_v42 }
 0x19d   :  { %v3755_v37 = vpop.f32.mrf.mxu0 }
 0x1a4   :  { %v2191_v1 = vpop.f32.mrf.mxu1 }
 0x1a5   :  { %v2192_v47 = vadd.f32 %v2191_v1, %v2113_v0 }
 0x1a6   :  { %v3770_v41 = vpop.f32.mrf.mxu1 }
 0x1a9   :  { %v2280_v61 = vpop.f32.mrf.mxu0 }
 0x1aa   :  { %v2281_v49 = vadd.f32 %v2280_v61, %v2192_v47 }
 0x1ab   :  { %v3785_v46 = vpop.f32.mrf.mxu0 }
 0x1b2   :  { %v2357_v50 = vpop.f32.mrf.mxu1 }
 0x1b3   :  { %v2358_v51 = vadd.f32 %v2357_v50, %v2281_v49 }
 0x1b4   :  { %v3800_v53 = vpop.f32.mrf.mxu1 }
 0x1b5   :  { %2368 = vst [vmem:[#allocation12 + $0x8] sm:$0xf] %v2358_v51 }
 0x1b6   :  { %3947 = shalt.err (!%p3944_p6)
}
 0x1b7   :  { %3498 = dma.vmem_to_hbm [thread:$0]  %s3496_s24, 192, %s4995_s8, [#allocation13]   ;;  %v2453_v4 = vpop.f32.mrf.mxu0 }
 0x1b8   :  { %s4021_s8 = smov [#allocation14]  }
 0x1b9   :  { %v2455_v5 = vpop.f32.mrf.mxu0  ;;  %s3505_s1 = sshll.u32 %s4021_s8, 4  ;;  %s3506_s1 = int_to_ptr.vmem [resolvable:$true] %s3505_s1 }
 0x1ba   :  { %s3956_s28 = scalar_lea.vmem %s3506_s1, 128  ;;  %p3961_p8 = scmp.lt.s32.totalorder %s3506_s1, %s3506_s1 }
 0x1bb   :  { %v2565_v6 = vpop.f32.mrf.mxu1  ;;  %p3957_p7 = scmp.ne.s32.totalorder %s3506_s1, %s3956_s28  ;;  %p3962_p9 = scmp.lt.s32.totalorder %s3956_s28, %s3956_s28 }
 0x1bc   :  { %v2566_v31 = vadd.f32 %v2565_v6, %v2453_v4 }
 0x1bd   :  { %v2567_v10 = vpop.f32.mrf.mxu1  ;;  %p3963_p10 = por %p3962_p9, %p3961_p8 }
 0x1be   :  { %v2654_v16 = vpop.f32.mrf.mxu0  ;;  %v2568_v35 = vadd.f32 %v2567_v10, %v2455_v5 }
 0x1bf   :  { %v2655_v55 = vadd.f32 %v2654_v16, %v2566_v31  ;;  %p3964_p11 = pnand %p3963_p10, %p3957_p7 }
 0x1c0   :  { %v2656_v56 = vpop.f32.mrf.mxu0 }
 0x1c1   :  { %v2657_v62 = vadd.f32 %v2656_v56, %v2568_v35 }
 0x1c5   :  { %v2736_v21 = vpop.f32.mrf.mxu1 }
 0x1c6   :  { %v2737_v9 = vadd.f32 %v2736_v21, %v2655_v55 }
 0x1c7   :  { %v2738_v11 = vpop.f32.mrf.mxu1 }
 0x1c8   :  { %v2832_v57 = vpop.f32.mrf.mxu0  ;;  %v2739_v27 = vadd.f32 %v2738_v11, %v2657_v62 }
 0x1c9   :  { %v2833_v44 = vadd.f32 %v2832_v57, %v2737_v9 }
 0x1ca   :  { %v2834_v36 = vpop.f32.mrf.mxu0 }
 0x1cb   :  { %v2835_v38 = vadd.f32 %v2834_v36, %v2739_v27 }
 0x1cf   :  { %v2912_v34 = vpop.f32.mrf.mxu1 }
 0x1d0   :  { %v2913_v54 = vadd.f32 %v2912_v34, %v2833_v44 }
 0x1d1   :  { %v2914_v25 = vpop.f32.mrf.mxu1 }
 0x1d2   :  { %v2915_v14 = vadd.f32 %v2914_v25, %v2835_v38 }
 0x1d4   :  { %v2919_v18 = vcombine.low %v2913_v54, %v2915_v14 }
 0x1d6   :  { %2924 = vst [vmem:[#allocation14] sm:$0xff] %v2919_v18 }
 0x1d7   :  { %3967 = shalt.err (!%p3964_p11)
}
 0x1d8   :  { %3508 = dma.vmem_to_hbm [thread:$0]  %s3506_s1, 128, %s4996_s9, [#allocation13]   ;;  %v3008_v30 = vpop.f32.mrf.mxu0 }
 0x1d9   :  { %v3120_v7 = vpop.f32.mrf.mxu1  ;;  %s4022_s9 = smov [#allocation15]  }
 0x1da   :  { %v3010_v15 = vpop.f32.mrf.mxu0  ;;  %v3121_v2 = vadd.f32 %v3120_v7, %v3008_v30  ;;  %s3515_s11 = sshll.u32 %s4022_s9, 4  ;;  %s3516_s11 = int_to_ptr.vmem [resolvable:$true] %s3515_s11 }
 0x1db   :  { %v3122_v19 = vpop.f32.mrf.mxu1  ;;  %s3976_s12 = scalar_lea.vmem %s3516_s11, 128  ;;  %p3981_p13 = scmp.lt.s32.totalorder %s3516_s11, %s3516_s11 }
 0x1dc   :  { %v3209_v39 = vpop.f32.mrf.mxu0  ;;  %v3123_v63 = vadd.f32 %v3122_v19, %v3010_v15  ;;  %p3977_p12 = scmp.ne.s32.totalorder %s3516_s11, %s3976_s12  ;;  %p3982_p0 = scmp.lt.s32.totalorder %s3976_s12, %s3976_s12 }
 0x1dd   :  { %v3210_v13 = vadd.f32 %v3209_v39, %v3121_v2 }
 0x1de   :  { %v3211_v26 = vpop.f32.mrf.mxu0  ;;  %p3983_p1 = por %p3982_p0, %p3981_p13 }
 0x1df   :  { %v3212_v58 = vadd.f32 %v3211_v26, %v3123_v63 }
 0x1e0   :  { %p3984_p2 = pnand %p3983_p1, %p3977_p12 }
 0x1e3   :  { %v3291_v20 = vpop.f32.mrf.mxu1 }
 0x1e4   :  { %v3292_v59 = vadd.f32 %v3291_v20, %v3210_v13 }
 0x1e5   :  { %v3293_v32 = vpop.f32.mrf.mxu1 }
 0x1e6   :  { %v3387_v48 = vpop.f32.mrf.mxu0  ;;  %v3294_v3 = vadd.f32 %v3293_v32, %v3212_v58 }
 0x1e7   :  { %v3388_v12 = vadd.f32 %v3387_v48, %v3292_v59 }
 0x1e8   :  { %v3389_v8 = vpop.f32.mrf.mxu0 }
 0x1e9   :  { %v3390_v60 = vadd.f32 %v3389_v8, %v3294_v3 }
 0x1ed   :  { %v3467_v52 = vpop.f32.mrf.mxu1 }
 0x1ee   :  { %v3468_v24 = vadd.f32 %v3467_v52, %v3388_v12 }
 0x1ef   :  { %v3469_v33 = vpop.f32.mrf.mxu1 }
 0x1f0   :  { %v3470_v45 = vadd.f32 %v3469_v33, %v3390_v60 }
 0x1f2   :  { %v3474_v17 = vcombine.low %v3468_v24, %v3470_v45 }
 0x1f4   :  { %3478 = vst [vmem:[#allocation15] sm:$0xff] %v3474_v17 }
 0x1f5   :  { %3987 = shalt.err (!%p3984_p2)
}
 0x1f6   :  { %3518 = dma.vmem_to_hbm [thread:$0]  %s3516_s11, 128, %s4997_s10, [#allocation16]  }
 0x1f7   :  { %4002 = dma.done.wait [#allocation4], 192  }
 0x1f8   :  { %4003 = vsyncadd [#allocation4], 4294967104 }
 0x1f9   :  { %4004 = dma.done.wait [#allocation13], 320  }
 0x1fa   :  { %4005 = vsyncadd [#allocation13], 4294966976 }
 0x1fb   :  { %4006 = dma.done.wait [#allocation16], 128  }
 0x1fc   :  { %4007 = vsyncadd [#allocation16], 4294967168 }
 0x1fd   :  { %3531 = vsyncpa [#allocation3], 1 }
 0x1fe   :  { %3532 = vsyncpa [#allocation6], 1 }
 0x1ff   :  { %3533 = vsyncpa [#allocation9], 1 }
 0x200   :  { %3534 = vsyncpa [#allocation4], 1 }
 0x201   :  { %3535 = vsyncpa [#allocation13], 1 }
 0x202   :  { %3536 = vsyncpa [#allocation16], 1 }

</bundles_post_ra>
